<compile_context>
chip_gen: v7x
topology: tpu7x:2x2x1
jax: 0.10.0
libtpu: 0.0.40
codegen_flags: <defaults>
</compile_context>

<pallas_src>
import functools

import jax
import jax.numpy as jnp
import numpy as np
from jax.experimental import pallas as pl
from jax.experimental.pallas import tpu as pltpu


def _im2col_3x3(x, H, W, C):
    """x: (H, W, C). Returns (H*W, 9*C) patches for a 3x3 / stride-1 / pad-1 conv.

    The 9*C axis is ordered (dy, dx, c), matching an HWIO weight reshaped to
    (9*C, Cout). Zero padding is synthesized with zero strips (no padded
    scratch buffer, no HBM-side pad).
    """
    zrow = jnp.zeros((1, W, C), x.dtype)
    zcol = jnp.zeros((H, 1, C), x.dtype)
    cols = []
    for dy in range(3):
        oy = dy - 1
        if oy < 0:
            xs = jnp.concatenate([zrow, x[:H - 1]], axis=0)
        elif oy == 0:
            xs = x
        else:
            xs = jnp.concatenate([x[1:], zrow], axis=0)
        xp = jnp.concatenate([zcol, xs, zcol], axis=1)          # (H, W+2, C)
        for dx in range(3):
            cols.append(xp[:, dx:dx + W, :])
    return jnp.concatenate(cols, axis=-1).reshape(H * W, 9 * C)


def basic_block_kernel(x_ref, w1_ref, s1_ref, b1_ref, w2_ref, s2_ref, b2_ref,
                       out_ref, *, H, W, Cin, Cout):
    x = x_ref[0]                                                # (H, W, Cin) bf16

    # ---- conv1 (3x3, pad 1) as a single im2col matmul, K = 9*Cin ----
    p1 = _im2col_3x3(x, H, W, Cin)                              # (H*W, 9*Cin)
    acc1 = jnp.dot(p1, w1_ref[...], preferred_element_type=jnp.float32)
    out1 = jnp.maximum(acc1 * s1_ref[...] + b1_ref[...], 0.0)   # f32 (H*W, Cout)

    # ---- conv2 (3x3, pad 1) + bn2 ----
    # relu(out1) >= 0 and the synthesized halo is exactly zero, so conv2's
    # padding semantics are preserved without any padded scratch buffer.
    h1 = out1.astype(jnp.bfloat16).reshape(H, W, Cout)
    p2 = _im2col_3x3(h1, H, W, Cout)                            # (H*W, 9*Cout)
    acc2 = jnp.dot(p2, w2_ref[...], preferred_element_type=jnp.float32)
    out2 = acc2 * s2_ref[...] + b2_ref[...]

    # ---- residual add (read from the same x block -> no duplicate DMA) + relu
    out2 = out2 + x.reshape(H * W, Cin).astype(jnp.float32)
    out2 = jnp.maximum(out2, 0.0)
    out_ref[0] = out2.reshape(H, W, Cout).astype(out_ref.dtype)


def basic_block(x_nhwc, w1_hwio, bn1_params, w2_hwio, bn2_params, eps=1e-5):
    """x_nhwc: (N, H, W, Cin) float32. Returns (N, H, W, Cout) float32."""
    N, H, W, Cin = x_nhwc.shape
    Cout = w1_hwio.shape[-1]
    assert Cin == Cout, "no-downsample BasicBlock requires Cin == Cout"

    # Fold BN (eval mode) into per-channel scale / bias (kept in f32).
    def fold(p):
        gamma, beta, mean, var = (jnp.asarray(t, jnp.float32) for t in p)
        s = gamma / jnp.sqrt(var + eps)
        b = beta - mean * s
        return s.reshape(1, Cout), b.reshape(1, Cout)

    s1, b1 = fold(bn1_params)
    s2, b2 = fold(bn2_params)

    # bf16 MXU inputs (halves DMA bytes / VMEM); accumulation stays f32.
    x_bf = x_nhwc.astype(jnp.bfloat16)
    w1 = w1_hwio.reshape(9 * Cin, Cout).astype(jnp.bfloat16)    # (dy,dx,ci) rows
    w2 = w2_hwio.reshape(9 * Cout, Cout).astype(jnp.bfloat16)

    kernel = functools.partial(basic_block_kernel, H=H, W=W, Cin=Cin, Cout=Cout)

    return pl.pallas_call(
        kernel,
        out_shape=jax.ShapeDtypeStruct((N, H, W, Cout), x_nhwc.dtype),
        grid=(N,),
        in_specs=[
            pl.BlockSpec((1, H, W, Cin), lambda n: (n, 0, 0, 0)),   # x (also residual)
            pl.BlockSpec((9 * Cin, Cout), lambda n: (0, 0)),        # w1 im2col matrix
            pl.BlockSpec((1, Cout), lambda n: (0, 0)),              # bn1 scale
            pl.BlockSpec((1, Cout), lambda n: (0, 0)),              # bn1 bias
            pl.BlockSpec((9 * Cout, Cout), lambda n: (0, 0)),       # w2 im2col matrix
            pl.BlockSpec((1, Cout), lambda n: (0, 0)),              # bn2 scale
            pl.BlockSpec((1, Cout), lambda n: (0, 0)),              # bn2 bias
        ],
        out_specs=pl.BlockSpec((1, H, W, Cout), lambda n: (n, 0, 0, 0)),
        compiler_params=pltpu.CompilerParams(
            dimension_semantics=("parallel",)),
    )(x_bf, w1, s1, b1, w2, s2, b2)


def basic_block_reference(x_nhwc, w1, bn1_params, w2, bn2_params, eps=1e-5):
    dn = ("NHWC", "HWIO", "NHWC")

    def bn(o, p):
        gamma, beta, mean, var = p
        return (o - mean) / jnp.sqrt(var + eps) * gamma + beta

    out = jax.lax.conv_general_dilated(x_nhwc, w1, (1, 1), "SAME",
                                       dimension_numbers=dn)
    out = jnp.maximum(bn(out, bn1_params), 0.0)
    out = jax.lax.conv_general_dilated(out, w2, (1, 1), "SAME",
                                       dimension_numbers=dn)
    out = bn(out, bn2_params) + x_nhwc
    return jnp.maximum(out, 0.0)


if __name__ == "__main__":
    key = jax.random.PRNGKey(0)
    k_x, k_w1, k_w2 = jax.random.split(key, 3)

    N, C, H, W = 2, 4, 16, 16  # in_planes = out_planes = 4, stride = 1

    # PyTorch-style NCHW input -> NHWC for the kernel.
    x_nchw = jax.random.normal(k_x, (N, C, H, W), dtype=jnp.float32)
    x_nhwc = jnp.transpose(x_nchw, (0, 2, 3, 1))

    # Deterministic synthetic parameters (HWIO conv weights, no bias).
    w1 = 0.1 * jax.random.normal(k_w1, (3, 3, C, C), dtype=jnp.float32)
    w2 = 0.1 * jax.random.normal(k_w2, (3, 3, C, C), dtype=jnp.float32)

    def make_bn(offset):
        gamma = 1.0 + 0.1 * jnp.arange(C, dtype=jnp.float32) + offset
        beta = 0.05 * jnp.arange(C, dtype=jnp.float32) - offset
        mean = 0.02 * jnp.arange(C, dtype=jnp.float32)
        var = 1.0 + 0.1 * jnp.arange(C, dtype=jnp.float32)
        return (gamma, beta, mean, var)

    bn1 = make_bn(0.0)
    bn2 = make_bn(0.1)

    out = basic_block(x_nhwc, w1, bn1, w2, bn2)
    out = jax.block_until_ready(out)

    ref = jax.block_until_ready(basic_block_reference(x_nhwc, w1, bn1, w2, bn2))
    # bf16 MXU inputs -> looser tolerance vs the f32 reference (acc/BN are f32).
    np.testing.assert_allclose(np.asarray(out), np.asarray(ref),
                               rtol=5e-2, atol=5e-2)

    print("KERNEL_OK")
</pallas_src>

<mosaic_0001>
module attributes {stable_mosaic.version = 11 : i64} {
  func.func @basic_block_kernel(%arg0: i32, %arg1: memref<1x16x16x4xbf16, #tpu.memory_space<vmem>>, %arg2: memref<36x4xbf16, #tpu.memory_space<vmem>>, %arg3: memref<1x4xf32, #tpu.memory_space<vmem>>, %arg4: memref<1x4xf32, #tpu.memory_space<vmem>>, %arg5: memref<36x4xbf16, #tpu.memory_space<vmem>>, %arg6: memref<1x4xf32, #tpu.memory_space<vmem>>, %arg7: memref<1x4xf32, #tpu.memory_space<vmem>>, %arg8: memref<1x16x16x4xf32, #tpu.memory_space<vmem>>) attributes {dimension_semantics = [#tpu.dimension_semantics<parallel>], iteration_bounds = array<i64: 2>, scalar_prefetch = 0 : i64, scratch_operands = 0 : i64, tpu.core_type = #tpu.core_type<tc>, window_params = [{transform_indices = @transform_0, window_bounds = array<i64: 1, 16, 16, 4>}, {pipeline_mode = #tpu.pipeline_mode<synchronous>, transform_indices = @transform_1, window_bounds = array<i64: 36, 4>}, {pipeline_mode = #tpu.pipeline_mode<synchronous>, transform_indices = @transform_2, window_bounds = array<i64: 1, 4>}, {pipeline_mode = #tpu.pipeline_mode<synchronous>, transform_indices = @transform_3, window_bounds = array<i64: 1, 4>}, {pipeline_mode = #tpu.pipeline_mode<synchronous>, transform_indices = @transform_4, window_bounds = array<i64: 36, 4>}, {pipeline_mode = #tpu.pipeline_mode<synchronous>, transform_indices = @transform_5, window_bounds = array<i64: 1, 4>}, {pipeline_mode = #tpu.pipeline_mode<synchronous>, transform_indices = @transform_6, window_bounds = array<i64: 1, 4>}, {transform_indices = @transform_7, window_bounds = array<i64: 1, 16, 16, 4>}]} {
    %c0 = arith.constant 0 : index
    %c0_0 = arith.constant 0 : index
    %c0_1 = arith.constant 0 : index
    %c0_2 = arith.constant 0 : index
    %0 = vector.load %arg1[%c0, %c0_0, %c0_1, %c0_2] : memref<1x16x16x4xbf16, #tpu.memory_space<vmem>>, vector<1x16x16x4xbf16>
    %1 = vector.shape_cast %0 : vector<1x16x16x4xbf16> to vector<16x16x4xbf16>
    %cst = arith.constant 0.000000e+00 : bf16
    %2 = vector.broadcast %cst : bf16 to vector<1x16x4xbf16>
    %cst_3 = arith.constant 0.000000e+00 : bf16
    %3 = vector.broadcast %cst_3 : bf16 to vector<16x1x4xbf16>
    %4 = vector.extract_strided_slice %1 {offsets = [0, 0, 0], sizes = [15, 16, 4], strides = [1, 1, 1]} : vector<16x16x4xbf16> to vector<15x16x4xbf16>
    %5 = tpu.concatenate %2, %4 in 0 : vector<1x16x4xbf16>, vector<15x16x4xbf16> -> vector<16x16x4xbf16>
    %6 = tpu.concatenate %3, %5, %3 in 1 : vector<16x1x4xbf16>, vector<16x16x4xbf16>, vector<16x1x4xbf16> -> vector<16x18x4xbf16>
    %7 = vector.extract_strided_slice %6 {offsets = [0, 0, 0], sizes = [16, 16, 4], strides = [1, 1, 1]} : vector<16x18x4xbf16> to vector<16x16x4xbf16>
    %8 = vector.extract_strided_slice %6 {offsets = [0, 1, 0], sizes = [16, 16, 4], strides = [1, 1, 1]} : vector<16x18x4xbf16> to vector<16x16x4xbf16>
    %9 = vector.extract_strided_slice %6 {offsets = [0, 2, 0], sizes = [16, 16, 4], strides = [1, 1, 1]} : vector<16x18x4xbf16> to vector<16x16x4xbf16>
    %10 = tpu.concatenate %3, %1, %3 in 1 : vector<16x1x4xbf16>, vector<16x16x4xbf16>, vector<16x1x4xbf16> -> vector<16x18x4xbf16>
    %11 = vector.extract_strided_slice %10 {offsets = [0, 0, 0], sizes = [16, 16, 4], strides = [1, 1, 1]} : vector<16x18x4xbf16> to vector<16x16x4xbf16>
    %12 = vector.extract_strided_slice %10 {offsets = [0, 1, 0], sizes = [16, 16, 4], strides = [1, 1, 1]} : vector<16x18x4xbf16> to vector<16x16x4xbf16>
    %13 = vector.extract_strided_slice %10 {offsets = [0, 2, 0], sizes = [16, 16, 4], strides = [1, 1, 1]} : vector<16x18x4xbf16> to vector<16x16x4xbf16>
    %14 = vector.extract_strided_slice %1 {offsets = [1, 0, 0], sizes = [15, 16, 4], strides = [1, 1, 1]} : vector<16x16x4xbf16> to vector<15x16x4xbf16>
    %15 = tpu.concatenate %14, %2 in 0 : vector<15x16x4xbf16>, vector<1x16x4xbf16> -> vector<16x16x4xbf16>
    %16 = tpu.concatenate %3, %15, %3 in 1 : vector<16x1x4xbf16>, vector<16x16x4xbf16>, vector<16x1x4xbf16> -> vector<16x18x4xbf16>
    %17 = vector.extract_strided_slice %16 {offsets = [0, 0, 0], sizes = [16, 16, 4], strides = [1, 1, 1]} : vector<16x18x4xbf16> to vector<16x16x4xbf16>
    %18 = vector.extract_strided_slice %16 {offsets = [0, 1, 0], sizes = [16, 16, 4], strides = [1, 1, 1]} : vector<16x18x4xbf16> to vector<16x16x4xbf16>
    %19 = vector.extract_strided_slice %16 {offsets = [0, 2, 0], sizes = [16, 16, 4], strides = [1, 1, 1]} : vector<16x18x4xbf16> to vector<16x16x4xbf16>
    %20 = tpu.concatenate %7, %8, %9, %11, %12, %13, %17, %18, %19 in 2 : vector<16x16x4xbf16>, vector<16x16x4xbf16>, vector<16x16x4xbf16>, vector<16x16x4xbf16>, vector<16x16x4xbf16>, vector<16x16x4xbf16>, vector<16x16x4xbf16>, vector<16x16x4xbf16>, vector<16x16x4xbf16> -> vector<16x16x36xbf16>
    %21 = vector.shape_cast %20 : vector<16x16x36xbf16> to vector<256x36xbf16>
    %c0_4 = arith.constant 0 : index
    %c0_5 = arith.constant 0 : index
    %22 = vector.load %arg2[%c0_4, %c0_5] : memref<36x4xbf16, #tpu.memory_space<vmem>>, vector<36x4xbf16>
    %cst_6 = arith.constant dense<0.000000e+00> : vector<256x4xf32>
    %23 = tpu.matmul %21, %22, %cst_6 {dimension_numbers = #tpu.dot_dimension_numbers<[1], [0], [0], [1], [0, 0, 1, 1], [], []>} : vector<256x36xbf16>, vector<36x4xbf16>, vector<256x4xf32> -> vector<256x4xf32>
    %c0_7 = arith.constant 0 : index
    %c0_8 = arith.constant 0 : index
    %24 = vector.load %arg3[%c0_7, %c0_8] : memref<1x4xf32, #tpu.memory_space<vmem>>, vector<1x4xf32>
    %25 = vector.broadcast %24 : vector<1x4xf32> to vector<256x4xf32>
    %26 = arith.mulf %23, %25 : vector<256x4xf32>
    %c0_9 = arith.constant 0 : index
    %c0_10 = arith.constant 0 : index
    %27 = vector.load %arg4[%c0_9, %c0_10] : memref<1x4xf32, #tpu.memory_space<vmem>>, vector<1x4xf32>
    %28 = vector.broadcast %27 : vector<1x4xf32> to vector<256x4xf32>
    %29 = arith.addf %26, %28 : vector<256x4xf32>
    %cst_11 = arith.constant 0.000000e+00 : f32
    %30 = vector.broadcast %cst_11 : f32 to vector<256x4xf32>
    %31 = arith.maximumf %29, %30 : vector<256x4xf32>
    %32 = arith.truncf %31 : vector<256x4xf32> to vector<256x4xbf16>
    %33 = vector.shape_cast %32 : vector<256x4xbf16> to vector<16x16x4xbf16>
    %cst_12 = arith.constant 0.000000e+00 : bf16
    %34 = vector.broadcast %cst_12 : bf16 to vector<1x16x4xbf16>
    %cst_13 = arith.constant 0.000000e+00 : bf16
    %35 = vector.broadcast %cst_13 : bf16 to vector<16x1x4xbf16>
    %36 = vector.extract_strided_slice %33 {offsets = [0, 0, 0], sizes = [15, 16, 4], strides = [1, 1, 1]} : vector<16x16x4xbf16> to vector<15x16x4xbf16>
    %37 = tpu.concatenate %34, %36 in 0 : vector<1x16x4xbf16>, vector<15x16x4xbf16> -> vector<16x16x4xbf16>
    %38 = tpu.concatenate %35, %37, %35 in 1 : vector<16x1x4xbf16>, vector<16x16x4xbf16>, vector<16x1x4xbf16> -> vector<16x18x4xbf16>
    %39 = vector.extract_strided_slice %38 {offsets = [0, 0, 0], sizes = [16, 16, 4], strides = [1, 1, 1]} : vector<16x18x4xbf16> to vector<16x16x4xbf16>
    %40 = vector.extract_strided_slice %38 {offsets = [0, 1, 0], sizes = [16, 16, 4], strides = [1, 1, 1]} : vector<16x18x4xbf16> to vector<16x16x4xbf16>
    %41 = vector.extract_strided_slice %38 {offsets = [0, 2, 0], sizes = [16, 16, 4], strides = [1, 1, 1]} : vector<16x18x4xbf16> to vector<16x16x4xbf16>
    %42 = tpu.concatenate %35, %33, %35 in 1 : vector<16x1x4xbf16>, vector<16x16x4xbf16>, vector<16x1x4xbf16> -> vector<16x18x4xbf16>
    %43 = vector.extract_strided_slice %42 {offsets = [0, 0, 0], sizes = [16, 16, 4], strides = [1, 1, 1]} : vector<16x18x4xbf16> to vector<16x16x4xbf16>
    %44 = vector.extract_strided_slice %42 {offsets = [0, 1, 0], sizes = [16, 16, 4], strides = [1, 1, 1]} : vector<16x18x4xbf16> to vector<16x16x4xbf16>
    %45 = vector.extract_strided_slice %42 {offsets = [0, 2, 0], sizes = [16, 16, 4], strides = [1, 1, 1]} : vector<16x18x4xbf16> to vector<16x16x4xbf16>
    %46 = vector.extract_strided_slice %33 {offsets = [1, 0, 0], sizes = [15, 16, 4], strides = [1, 1, 1]} : vector<16x16x4xbf16> to vector<15x16x4xbf16>
    %47 = tpu.concatenate %46, %34 in 0 : vector<15x16x4xbf16>, vector<1x16x4xbf16> -> vector<16x16x4xbf16>
    %48 = tpu.concatenate %35, %47, %35 in 1 : vector<16x1x4xbf16>, vector<16x16x4xbf16>, vector<16x1x4xbf16> -> vector<16x18x4xbf16>
    %49 = vector.extract_strided_slice %48 {offsets = [0, 0, 0], sizes = [16, 16, 4], strides = [1, 1, 1]} : vector<16x18x4xbf16> to vector<16x16x4xbf16>
    %50 = vector.extract_strided_slice %48 {offsets = [0, 1, 0], sizes = [16, 16, 4], strides = [1, 1, 1]} : vector<16x18x4xbf16> to vector<16x16x4xbf16>
    %51 = vector.extract_strided_slice %48 {offsets = [0, 2, 0], sizes = [16, 16, 4], strides = [1, 1, 1]} : vector<16x18x4xbf16> to vector<16x16x4xbf16>
    %52 = tpu.concatenate %39, %40, %41, %43, %44, %45, %49, %50, %51 in 2 : vector<16x16x4xbf16>, vector<16x16x4xbf16>, vector<16x16x4xbf16>, vector<16x16x4xbf16>, vector<16x16x4xbf16>, vector<16x16x4xbf16>, vector<16x16x4xbf16>, vector<16x16x4xbf16>, vector<16x16x4xbf16> -> vector<16x16x36xbf16>
    %53 = vector.shape_cast %52 : vector<16x16x36xbf16> to vector<256x36xbf16>
    %c0_14 = arith.constant 0 : index
    %c0_15 = arith.constant 0 : index
    %54 = vector.load %arg5[%c0_14, %c0_15] : memref<36x4xbf16, #tpu.memory_space<vmem>>, vector<36x4xbf16>
    %cst_16 = arith.constant dense<0.000000e+00> : vector<256x4xf32>
    %55 = tpu.matmul %53, %54, %cst_16 {dimension_numbers = #tpu.dot_dimension_numbers<[1], [0], [0], [1], [0, 0, 1, 1], [], []>} : vector<256x36xbf16>, vector<36x4xbf16>, vector<256x4xf32> -> vector<256x4xf32>
    %c0_17 = arith.constant 0 : index
    %c0_18 = arith.constant 0 : index
    %56 = vector.load %arg6[%c0_17, %c0_18] : memref<1x4xf32, #tpu.memory_space<vmem>>, vector<1x4xf32>
    %57 = vector.broadcast %56 : vector<1x4xf32> to vector<256x4xf32>
    %58 = arith.mulf %55, %57 : vector<256x4xf32>
    %c0_19 = arith.constant 0 : index
    %c0_20 = arith.constant 0 : index
    %59 = vector.load %arg7[%c0_19, %c0_20] : memref<1x4xf32, #tpu.memory_space<vmem>>, vector<1x4xf32>
    %60 = vector.broadcast %59 : vector<1x4xf32> to vector<256x4xf32>
    %61 = arith.addf %58, %60 : vector<256x4xf32>
    %62 = vector.shape_cast %1 : vector<16x16x4xbf16> to vector<256x4xbf16>
    %63 = arith.extf %62 : vector<256x4xbf16> to vector<256x4xf32>
    %64 = arith.addf %61, %63 : vector<256x4xf32>
    %cst_21 = arith.constant 0.000000e+00 : f32
    %65 = vector.broadcast %cst_21 : f32 to vector<256x4xf32>
    %66 = arith.maximumf %64, %65 : vector<256x4xf32>
    %67 = vector.shape_cast %66 : vector<256x4xf32> to vector<16x16x4xf32>
    %c0_22 = arith.constant 0 : index
    %c0_23 = arith.constant 0 : index
    %c0_24 = arith.constant 0 : index
    %c0_25 = arith.constant 0 : index
    %68 = vector.load %arg8[%c0_22, %c0_23, %c0_24, %c0_25] : memref<1x16x16x4xf32, #tpu.memory_space<vmem>>, vector<1x16x16x4xf32>
    %69 = vector.shape_cast %68 : vector<1x16x16x4xf32> to vector<16x16x4xf32>
    %70 = vector.shape_cast %67 : vector<16x16x4xf32> to vector<1x16x16x4xf32>
    tpu.vector_store %arg8[%c0_22, %c0_23, %c0_24, %c0_25], %70 {strides = array<i32>} : memref<1x16x16x4xf32, #tpu.memory_space<vmem>>, vector<1x16x16x4xf32>,
    return
  }
  func.func @transform_0(%arg0: i32) -> (i32, i32, i32, i32) {
    %c0_i32 = arith.constant 0 : i32
    %c0_i32_0 = arith.constant 0 : i32
    %c0_i32_1 = arith.constant 0 : i32
    %c0_i32_2 = arith.constant 0 : i32
    return %arg0, %c0_i32, %c0_i32_0, %c0_i32_1 : i32, i32, i32, i32
  }
  func.func @transform_1(%arg0: i32) -> (i32, i32) {
    %c0_i32 = arith.constant 0 : i32
    %c0_i32_0 = arith.constant 0 : i32
    %c0_i32_1 = arith.constant 0 : i32
    return %c0_i32, %c0_i32_0 : i32, i32
  }
  func.func @transform_2(%arg0: i32) -> (i32, i32) {
    %c0_i32 = arith.constant 0 : i32
    %c0_i32_0 = arith.constant 0 : i32
    %c0_i32_1 = arith.constant 0 : i32
    return %c0_i32, %c0_i32_0 : i32, i32
  }
  func.func @transform_3(%arg0: i32) -> (i32, i32) {
    %c0_i32 = arith.constant 0 : i32
    %c0_i32_0 = arith.constant 0 : i32
    %c0_i32_1 = arith.constant 0 : i32
    return %c0_i32, %c0_i32_0 : i32, i32
  }
  func.func @transform_4(%arg0: i32) -> (i32, i32) {
    %c0_i32 = arith.constant 0 : i32
    %c0_i32_0 = arith.constant 0 : i32
    %c0_i32_1 = arith.constant 0 : i32
    return %c0_i32, %c0_i32_0 : i32, i32
  }
  func.func @transform_5(%arg0: i32) -> (i32, i32) {
    %c0_i32 = arith.constant 0 : i32
    %c0_i32_0 = arith.constant 0 : i32
    %c0_i32_1 = arith.constant 0 : i32
    return %c0_i32, %c0_i32_0 : i32, i32
  }
  func.func @transform_6(%arg0: i32) -> (i32, i32) {
    %c0_i32 = arith.constant 0 : i32
    %c0_i32_0 = arith.constant 0 : i32
    %c0_i32_1 = arith.constant 0 : i32
    return %c0_i32, %c0_i32_0 : i32, i32
  }
  func.func @transform_7(%arg0: i32) -> (i32, i32, i32, i32) {
    %c0_i32 = arith.constant 0 : i32
    %c0_i32_0 = arith.constant 0 : i32
    %c0_i32_1 = arith.constant 0 : i32
    %c0_i32_2 = arith.constant 0 : i32
    return %arg0, %c0_i32, %c0_i32_0, %c0_i32_1 : i32, i32, i32, i32
  }
}

</mosaic_0001>

<bundles_post_ra>
// kernel: tpu_custom_call.1
= control target key start
LH: loop header
LB: loop body
LE: loop exit
PB: predicated region body
PF: predicated region fallthrough
CT: control target
= control target key end

     0   :  { %s3515_s24 = smov 0   ;;  %s4939_s0 = inlined_call_operand.vmem [shape: bf16[2,16,16,4], index: 0, kind: input, shape index: {}]   ;;  %s4940_s1 = inlined_call_operand.vmem [shape: bf16[36,4], index: 1, kind: input, shape index: {}]   ;;  %s4941_s2 = inlined_call_operand.vmem [shape: f32[1,4], index: 2, kind: input, shape index: {}]   ;;  %s4942_s3 = inlined_call_operand.vmem [shape: f32[1,4], index: 3, kind: input, shape index: {}]   ;;  %s4943_s4 = inlined_call_operand.vmem [shape: bf16[36,4], index: 4, kind: input, shape index: {}]   ;;  %s4944_s5 = inlined_call_operand.vmem [shape: f32[1,4], index: 5, kind: input, shape index: {}]   ;;  %s4945_s6 = inlined_call_operand.vmem [shape: f32[1,4], index: 6, kind: input, shape index: {}]   ;;  %s4946_s7 = inlined_call_operand.vmem [shape: f32[2,16,16,4], index: 7, kind: output, shape index: {}]  }
   0x1 LB: > { %s3197_s25 = sadd.s32 4294967295, %s3464_s24   ;;  %p3201_p0 = scmp.ge.s32.totalorder %s3464_s24, 1  ;;  %s3464_s24 = sphi %s3515_s24, %s17_s24  }
   0x2   : > { %p237_p1 = scmp.lt.s32.totalorder %s3464_s24, 3 }
   0x4   : > { %p238_p2 = pnand %p3201_p0, %p237_p1 }
   0x5   : > { %vm531_vm0 = vcmask (!%p238_p2), 1040384   ;;  %vm532_vm1 = vsmask.f32 (!%p238_p2), 256  ;;  %v3466_v0 = vmov (!%p238_p2), 0   ;;  %p269_p3 = scmp.lt.s32.totalorder (!%p238_p2), %s3197_s25, 1  ;;  %vm853_vm3 = vcmask (!%p238_p2), 1046528  }
   0x6   : > { %241 = sbr.rel (%p238_p2) target bundleno = 1006 (0x3ee), region = 48  ;;  %v390_v1 = vrot.slane (!%p238_p2), %v3466_v0, 7  ;;  %vm3524_vm2 = vmand (!%p238_p2), %vm531_vm0, %vm532_vm1  ;;  %s3467_s30 = smov (!%p238_p2), 8   ;;  %vm596_vm4 = vsmask.f32 (!%p238_p2), 7424  ;;  %v3411_v41 = vld [vmem:[%s4940_s1] sm:$0xff] (!%p238_p2)  }
   0x7   : > { %s3468_s8 = smov (!%p238_p2), 4   ;;  %s3469_s9 = smov (!%p238_p2), 12   ;;  %3307 = vmatprep.subr.bf16.mxu0 (!%p238_p2), %v3411_v41  ;;  %v3413_v54 = vld [vmem:[%s4940_s1 + $0x8] sm:$0xff] (!%p238_p2)   ;;  %vm1477_vm5 = vcmask (!%p238_p2), 1041408   ;;  %vm1160_vm6 = vcmask (!%p238_p2), 31744   ;;  %vm1193_vm7 = vcmask (!%p238_p2), 64512  }
   0x8   : > { %v3530_v3 = vsel (!%p238_p2), %vm3524_vm2, 0, %v390_v1  ;;  %v550_v4 = vsel (!%p238_p2), %vm3524_vm2, %v390_v1, 0  ;;  %s3470_s12 = smov (!%p238_p2), 24   ;;  %3308 = vmatpush3.bf16.msra.mxu0 (!%p238_p2), %v3411_v41  ;;  %s3471_s15 = smov (!%p238_p2), 20   ;;  %vm1226_vm8 = vcmask (!%p238_p2), 97280   ;;  %vm1259_vm9 = vcmask (!%p238_p2), 130048  }
   0x9   : > { %v854_v5 = vrot.slane (!%p238_p2), %v3530_v3, 1  ;;  %v855_v6 = vrot.slane (!%p238_p2), %v550_v4, 1  ;;  %v598_v7 = vshrl.u32 (!%p238_p2), %v3530_v3, 16  ;;  %v600_v8 = vshll.u32 (!%p238_p2), %v3530_v3, 16  ;;  %3309 = vmatprep.subr.bf16.mxu0 (!%p238_p2), %v3413_v54  ;;  %s3472_s16 = smov (!%p238_p2), 16   ;;  %s3473_s17 = smov (!%p238_p2), 28  }
   0xa   : > { %v605_v9 = vshll.u32 (!%p238_p2), %v550_v4, 16  ;;  %s3474_s18 = smov (!%p238_p2), 32   ;;  %vm1292_vm10 = vcmask (!%p238_p2), 162816   ;;  %vm1325_vm11 = vcmask (!%p238_p2), 195584   ;;  %vm1358_vm12 = vcmask (!%p238_p2), 228352  }
   0xb   : > { %v3541_v10 = vsel (!%p238_p2), %vm853_vm3, %v854_v5, %v855_v6  ;;  %v602_v11 = vrot.slane (!%p238_p2), %v600_v8, 1  ;;  %vm1391_vm13 = vcmask (!%p238_p2), 261120   ;;  %vm1444_vm14 = vcmask (!%p238_p2), 293888  }
   0xc   : > { %902 = vrot.lane.b32.xlu1 (!%p238_p2), %v3541_v10, %s3467_s30  ;;  %v607_v12 = vrot.slane (!%p238_p2), %v605_v9, 1  ;;  %3310 = vmatpush3.bf16.msra.mxu0 (!%p238_p2), %v3413_v54 }
   0xd   : > { %s4950_s25 = smov (!%p269_p3, %s3197_s25), 1  ;;  %v603_v16 = vor.u32 %v602_v11, %v598_v7 }
   0xe   : > { %s3267_s26 = sshll.u32 %s4950_s25, 7 }
   0xf   : > { %s3546_s29 = scalar_lea.vmem %s4939_s0, %s3267_s26  ;;  %v3554_v17 = vsel %vm596_vm4, %v603_v16, %v607_v12 }
  0x10   : > { %v282_v13 = vld [vmem:[%s3546_s29 + $0x8] sm:$0xff]   ;;  %v280_v14 = vld [vmem:[%s3546_s29] sm:$0xff]   ;;  %v284_v15 = vld [vmem:[%s3546_s29 + $0x10] sm:$0xff]   ;;  %789 = vrot.lane.b32.xlu0 %v3554_v17, %s3468_s8 }
  0x11   : > { %v402_v18 = vshrl.u32 %v282_v13, 16  ;;  %v405_v19 = vshll.u32 %v282_v13, 16  ;;  %v395_v20 = vshrl.u32 %v280_v14, 16  ;;  %v398_v21 = vshll.u32 %v280_v14, 16  ;;  %v286_v44 = vld [vmem:[%s3546_s29 + $0x18] sm:$0xff]   ;;  %v288_v7 = vld [vmem:[%s3546_s29 + $0x20] sm:$0xff]  }
  0x12   : > { %v409_v22 = vshrl.u32 %v284_v15, 16  ;;  %v412_v23 = vshll.u32 %v284_v15, 16  ;;  %v416_v62 = vshrl.u32 %v286_v44, 16  ;;  %v419_v6 = vshll.u32 %v286_v44, 16 }
  0x13   : > { %v404_v24 = vrot.slane %v402_v18, 7  ;;  %v397_v25 = vrot.slane %v395_v20, 7  ;;  %v423_v14 = vshrl.u32 %v288_v7, 16  ;;  %v426_v20 = vshll.u32 %v288_v7, 16 }
  0x14   : > { %v411_v26 = vrot.slane %v409_v22, 7  ;;  %v418_v5 = vrot.slane %v416_v62, 7 }
  0x15   : > { %v407_v27 = vor.u32 %v405_v19, %v404_v24  ;;  %v400_v28 = vor.u32 %v398_v21, %v397_v25  ;;  %v551_v29 = vsel %vm3524_vm2, %v397_v25, 0  ;;  %v552_v35 = vsel %vm3524_vm2, %v404_v24, 0  ;;  %v3414_v21 = vld [vmem:[%s4940_s1 + $0x10] ss:$0 sps:$4 sm:$0x33]  }
  0x16   : > { %v414_v30 = vor.u32 %v412_v23, %v411_v26  ;;  %v858_v34 = vrot.slane %v551_v29, 1  ;;  %v617_v36 = vshll.u32 %v551_v29, 16  ;;  %v861_v42 = vrot.slane %v552_v35, 1  ;;  %3383 = vmatprep.subr.msk.bf16.mxu0 %vm1477_vm5, %v3414_v21 }
  0x17   : > { %v3562_v31 = vsel %vm3524_vm2, 0, %v407_v27  ;;  %v3566_v32 = vsel %vm3524_vm2, 0, %v400_v28  ;;  %v629_v48 = vshll.u32 %v552_v35, 16  ;;  %v553_v53 = vsel %vm3524_vm2, %v411_v26, 0 }
  0x18   : > { %937 = vrot.lane.b32.xlu1 %v3562_v31, %s3469_s9  ;;  %935 = vrot.lane.b32.xlu0 %v3566_v32, %s3469_s9  ;;  %v3574_v33 = vsel %vm3524_vm2, 0, %v414_v30  ;;  %v857_v37 = vrot.slane %v3566_v32, 1  ;;  %v610_v38 = vshrl.u32 %v3566_v32, 16  ;;  %v612_v39 = vshll.u32 %v3566_v32, 16  ;;  %v290_v30 = vld [vmem:[%s3546_s29 + $0x28] sm:$0xff]  }
  0x19   : > { %v624_v40 = vshll.u32 %v3562_v31, 16  ;;  %v860_v45 = vrot.slane %v3562_v31, 1  ;;  %v619_v46 = vrot.slane %v617_v36, 1  ;;  %v622_v47 = vshrl.u32 %v3562_v31, 16 }
  0x1a   : > { %v614_v43 = vrot.slane %v612_v39, 1  ;;  %v859_v49 = vsel %vm853_vm3, %v857_v37, %v858_v34  ;;  %v636_v52 = vshll.u32 %v3574_v33, 16  ;;  %v631_v56 = vrot.slane %v629_v48, 1  ;;  %v292_v48 = vld [vmem:[%s3546_s29 + $0x30] sm:$0xff]  }
  0x1b   : > { %v626_v51 = vrot.slane %v624_v40, 1  ;;  %v862_v55 = vsel %vm853_vm3, %v860_v45, %v861_v42  ;;  %v634_v57 = vshrl.u32 %v3574_v33, 16  ;;  %v641_v61 = vshll.u32 %v553_v53, 16 }
  0x1c   : > { %1050 = vrot.lane.b32.xlu1 %v3574_v33, %s3470_s12  ;;  %1048 = vrot.lane.b32.xlu0 %v3562_v31, %s3470_s12  ;;  %v615_v50 = vor.u32 %v614_v43, %v610_v38  ;;  %v638_v60 = vrot.slane %v636_v52, 1  ;;  %v421_v9 = vor.u32 %v419_v6, %v418_v5  ;;  %v863_v11 = vrot.slane %v3574_v33, 1  ;;  %v294_v6 = vld [vmem:[%s3546_s29 + $0x38] sm:$0xff]  }
  0x1d   : > { %v627_v59 = vor.u32 %v626_v51, %v622_v47  ;;  %v643_v4 = vrot.slane %v641_v61, 1  ;;  %v864_v12 = vrot.slane %v553_v53, 1  ;;  %v554_v18 = vsel %vm3524_vm2, %v418_v5, 0 }
  0x1e   : > { %v620_v58 = vsel %vm596_vm4, %v615_v50, %v619_v46  ;;  %v639_v1 = vor.u32 %v638_v60, %v634_v57  ;;  %v3616_v13 = vsel %vm3524_vm2, 0, %v421_v9  ;;  %v425_v19 = vrot.slane %v423_v14, 7 }
  0x1f   : > { %v632_v63 = vsel %vm596_vm4, %v627_v59, %v631_v56  ;;  %v865_v15 = vsel %vm853_vm3, %v863_v11, %v864_v12  ;;  %v648_v16 = vshll.u32 %v3616_v13, 16  ;;  %v646_v22 = vshrl.u32 %v3616_v13, 16 }
  0x20   : > { %1015 = vrot.lane.b32.xlu0 %v859_v49, %s3471_s15  ;;  %904 = vrot.lane.b32.xlu1 %v859_v49, %s3467_s30  ;;  %v644_v8 = vsel %vm596_vm4, %v639_v1, %v643_v4  ;;  %v653_v24 = vshll.u32 %v554_v18, 16  ;;  %v428_v25 = vor.u32 %v426_v20, %v425_v19  ;;  %v1479_v26 = vsel %vm1477_vm5, %v3414_v21, 0 }
  0x21   : > { %v650_v23 = vrot.slane %v648_v16, 1  ;;  %3312 = vmatpush3.bf16.msra.mxu0 %v1479_v26  ;;  %v866_v35 = vrot.slane %v3616_v13, 1  ;;  %v867_v36 = vrot.slane %v554_v18, 1  ;;  %v555_v38 = vsel %vm3524_vm2, %v425_v19, 0 }
  0x22   : > { %v655_v28 = vrot.slane %v653_v24, 1  ;;  %v3636_v29 = vsel %vm3524_vm2, 0, %v428_v25  ;;  %v665_v42 = vshll.u32 %v555_v38, 16  ;;  %v430_v43 = vshrl.u32 %v290_v30, 16  ;;  %v296_v24 = vld [vmem:[%s3546_s29 + $0x40] sm:$0xff]  }
  0x23   : > { %v651_v27 = vor.u32 %v650_v23, %v646_v22  ;;  %v660_v37 = vshll.u32 %v3636_v29, 16  ;;  %v868_v39 = vsel %vm853_vm3, %v866_v35, %v867_v36  ;;  %v658_v40 = vshrl.u32 %v3636_v29, 16 }
  0x24   : > { %1017 = vrot.lane.b32.xlu1 %v862_v55, %s3471_s15  ;;  %791 = vrot.lane.b32.xlu0 %v620_v58, %s3468_s8  ;;  %v667_v45 = vrot.slane %v665_v42, 1  ;;  %v432_v46 = vrot.slane %v430_v43, 7  ;;  %v433_v47 = vshll.u32 %v290_v30, 16  ;;  %v869_v51 = vrot.slane %v3636_v29, 1 }
  0x25   : > { %v656_v34 = vsel %vm596_vm4, %v651_v27, %v655_v28  ;;  %v662_v41 = vrot.slane %v660_v37, 1  ;;  %v870_v52 = vrot.slane %v555_v38, 1  ;;  %v437_v54 = vshrl.u32 %v292_v48, 16 }
  0x26   : > { %v435_v50 = vor.u32 %v433_v47, %v432_v46  ;;  %v556_v57 = vsel %vm3524_vm2, %v432_v46, 0  ;;  %v440_v59 = vshll.u32 %v292_v48, 16  ;;  %v444_v19 = vshrl.u32 %v294_v6, 16  ;;  %v298_v47 = vld [vmem:[%s3546_s29 + $0x48] sm:$0xff]  }
  0x27   : > { %v663_v44 = vor.u32 %v662_v41, %v658_v40  ;;  %v677_v62 = vshll.u32 %v556_v57, 16  ;;  %v873_v9 = vrot.slane %v556_v57, 1  ;;  %v447_v23 = vshll.u32 %v294_v6, 16 }
  0x28   : > { %981 = vrot.lane.b32.xlu1 %v632_v63, %s3472_s16  ;;  %979 = vrot.lane.b32.xlu0 %v620_v58, %s3472_s16  ;;  %v3665_v53 = vsel %vm3524_vm2, 0, %v435_v50  ;;  %v439_v58 = vrot.slane %v437_v54, 7  ;;  %v446_v22 = vrot.slane %v444_v19, 7 }
  0x29   : > { %v668_v49 = vsel %vm596_vm4, %v663_v44, %v667_v45  ;;  %v672_v56 = vshll.u32 %v3665_v53, 16  ;;  %v670_v60 = vshrl.u32 %v3665_v53, 16  ;;  %v679_v4 = vrot.slane %v677_v62, 1 }
  0x2a   : > { %v557_v12 = vsel %vm3524_vm2, %v439_v58, 0  ;;  %v449_v26 = vor.u32 %v447_v23, %v446_v22  ;;  %v558_v37 = vsel %vm3524_vm2, %v446_v22, 0 }
  0x2b   : > { %v674_v61 = vrot.slane %v672_v56, 1  ;;  %v689_v18 = vshll.u32 %v557_v12, 16  ;;  %v876_v28 = vrot.slane %v557_v12, 1  ;;  %v701_v42 = vshll.u32 %v558_v37, 16 }
  0x2c   : > { %1094 = vrot.lane.b32.xlu1 %v644_v8, %s3473_s17  ;;  %1092 = vrot.lane.b32.xlu0 %v632_v63, %s3473_s17  ;;  %v3709_v30 = vsel %vm3524_vm2, 0, %v449_v26  ;;  %v879_v50 = vrot.slane %v558_v37, 1 }
  0x2d   : > { %v675_v1 = vor.u32 %v674_v61, %v670_v60  ;;  %v691_v21 = vrot.slane %v689_v18, 1  ;;  %v696_v36 = vshll.u32 %v3709_v30, 16  ;;  %v694_v40 = vshrl.u32 %v3709_v30, 16 }
  0x2e   : > { %v703_v45 = vrot.slane %v701_v42, 1 }
  0x2f   : > { %v680_v7 = vsel %vm596_vm4, %v675_v1, %v679_v4  ;;  %v698_v41 = vrot.slane %v696_v36, 1  ;;  %v461_v1 = vshll.u32 %v298_v47, 16  ;;  %v300_v4 = vld [vmem:[%s3546_s29 + $0x50] sm:$0xff]  }
  0x30   : > { %793 = vrot.lane.b32.xlu1 %v632_v63, %s3468_s8  ;;  %1128 = vrot.lane.b32.xlu0 %v862_v55, %s3474_s18  ;;  %v442_v63 = vor.u32 %v440_v59, %v439_v58  ;;  %v458_v58 = vshrl.u32 %v298_v47, 16  ;;  %v465_v18 = vshrl.u32 %v300_v4, 16 }
  0x31   : > { %v699_v44 = vor.u32 %v698_v41, %v694_v40 }
  0x32   : > { %v3680_v5 = vsel %vm3524_vm2, 0, %v442_v63  ;;  %v460_v63 = vrot.slane %v458_v58, 7 }
  0x33   : > { %v684_v11 = vshll.u32 %v3680_v5, 16  ;;  %v875_v27 = vrot.slane %v3680_v5, 1  ;;  %v704_v48 = vsel %vm596_vm4, %v699_v44, %v703_v45 }
  0x34   : > { %795 = vrot.lane.b32.xlu1 %v644_v8, %s3468_s8  ;;  %1130 = vrot.lane.b32.xlu0 %v865_v15, %s3474_s18  ;;  %v560_v23 = vsel %vm3524_vm2, %v460_v63, 0 }
  0x35   : > { %v686_v16 = vrot.slane %v684_v11, 1  ;;  %v877_v35 = vsel %vm853_vm3, %v875_v27, %v876_v28  ;;  %v725_v28 = vshll.u32 %v560_v23, 16 }
  0x37   : > { %v727_v42 = vrot.slane %v725_v28, 1 }
  0x38   : > { %908 = vrot.lane.b32.xlu1 %v865_v15, %s3467_s30  ;;  %906 = vrot.lane.b32.xlu0 %v862_v55, %s3467_s30  ;;  %v871_v55 = vsel %vm853_vm3, %v869_v51, %v870_v52 }
  0x3c   : > { %941 = vrot.lane.b32.xlu1 %v3616_v13, %s3469_s9  ;;  %939 = vrot.lane.b32.xlu0 %v3574_v33, %s3469_s9 }
  0x40   : > { %985 = vrot.lane.b32.xlu1 %v656_v34, %s3472_s16  ;;  %983 = vrot.lane.b32.xlu0 %v644_v8, %s3472_s16  ;;  %v872_v8 = vrot.slane %v3665_v53, 1 }
  0x42   : > { %v874_v14 = vsel %vm853_vm3, %v872_v8, %v873_v9  ;;  %v463_v9 = vor.u32 %v461_v1, %v460_v63 }
  0x44   : > { %1021 = vrot.lane.b32.xlu1 %v868_v39, %s3471_s15  ;;  %1019 = vrot.lane.b32.xlu0 %v865_v15, %s3471_s15  ;;  %v682_v15 = vshrl.u32 %v3680_v5, 16 }
  0x46   : > { %v687_v20 = vor.u32 %v686_v16, %v682_v15  ;;  %v3758_v16 = vsel %vm3524_vm2, 0, %v463_v9 }
  0x47   : > { %v718_v26 = vshrl.u32 %v3758_v16, 16 }
  0x48   : > { %1054 = vrot.lane.b32.xlu1 %v3636_v29, %s3470_s12  ;;  %1052 = vrot.lane.b32.xlu0 %v3616_v13, %s3470_s12  ;;  %v692_v25 = vsel %vm596_vm4, %v687_v20, %v691_v21  ;;  %v720_v20 = vshll.u32 %v3758_v16, 16 }
  0x4a   : > { %v722_v27 = vrot.slane %v720_v20, 1 }
  0x4c   : > { %1098 = vrot.lane.b32.xlu1 %v668_v49, %s3473_s17  ;;  %1096 = vrot.lane.b32.xlu0 %v656_v34, %s3473_s17  ;;  %v723_v41 = vor.u32 %v722_v27, %v718_v26 }
  0x50   : > { %797 = vrot.lane.b32.xlu1 %v656_v34, %s3468_s8  ;;  %1132 = vrot.lane.b32.xlu0 %v868_v39, %s3474_s18  ;;  %v451_v34 = vshrl.u32 %v296_v24, 16 }
  0x52   : > { %v453_v38 = vrot.slane %v451_v34, 7 }
  0x54   : > { %799 = vrot.lane.b32.xlu1 %v668_v49, %s3468_s8  ;;  %1134 = vrot.lane.b32.xlu0 %v871_v55, %s3474_s18  ;;  %v559_v52 = vsel %vm3524_vm2, %v453_v38, 0 }
  0x55   : > { %v713_v57 = vshll.u32 %v559_v52, 16  ;;  %v882_v12 = vrot.slane %v559_v52, 1 }
  0x57   : > { %v715_v62 = vrot.slane %v713_v57, 1 }
  0x58   : > { %912 = vrot.lane.b32.xlu1 %v871_v55, %s3467_s30  ;;  %910 = vrot.lane.b32.xlu0 %v868_v39, %s3467_s30  ;;  %v454_v39 = vshll.u32 %v296_v24, 16  ;;  %v467_v24 = vrot.slane %v465_v18, 7 }
  0x5a   : > { %v456_v43 = vor.u32 %v454_v39, %v453_v38 }
  0x5c   : > { %945 = vrot.lane.b32.xlu1 %v3665_v53, %s3469_s9  ;;  %943 = vrot.lane.b32.xlu0 %v3636_v29, %s3469_s9  ;;  %v3724_v46 = vsel %vm3524_vm2, 0, %v456_v43 }
  0x5d   : > { %v708_v51 = vshll.u32 %v3724_v46, 16  ;;  %v881_v11 = vrot.slane %v3724_v46, 1 }
  0x5f   : > { %v710_v56 = vrot.slane %v708_v51, 1  ;;  %v3763_v19 = vsel %vm853_vm3, %v881_v11, %v882_v12  ;;  %v885_v51 = vrot.slane %v560_v23, 1 }
  0x60   : > { %989 = vrot.lane.b32.xlu1 %v680_v7, %s3472_s16  ;;  %987 = vrot.lane.b32.xlu0 %v668_v49, %s3472_s16  ;;  %v878_v49 = vrot.slane %v3709_v30, 1 }
  0x62   : > { %v880_v54 = vsel %vm853_vm3, %v878_v49, %v879_v50  ;;  %v302_v49 = vld [vmem:[%s3546_s29 + $0x58] sm:$0xff]  }
  0x63   : > { %v472_v11 = vshrl.u32 %v302_v49, 16 }
  0x64   : > { %1025 = vrot.lane.b32.xlu1 %v874_v14, %s3471_s15  ;;  %1023 = vrot.lane.b32.xlu0 %v871_v55, %s3471_s15  ;;  %v706_v55 = vshrl.u32 %v3724_v46, 16 }
  0x65   : > { %v474_v23 = vrot.slane %v472_v11, 7 }
  0x66   : > { %v711_v61 = vor.u32 %v710_v56, %v706_v55  ;;  %v884_v55 = vrot.slane %v3758_v16, 1 }
  0x68   : > { %1058 = vrot.lane.b32.xlu1 %v3680_v5, %s3470_s12  ;;  %1056 = vrot.lane.b32.xlu0 %v3665_v53, %s3470_s12  ;;  %v3748_v6 = vsel %vm596_vm4, %v711_v61, %v715_v62  ;;  %v886_v62 = vsel %vm853_vm3, %v884_v55, %v885_v51 }
  0x6c   : > { %1102 = vrot.lane.b32.xlu1 %v692_v25, %s3473_s17  ;;  %1100 = vrot.lane.b32.xlu0 %v680_v7, %s3473_s17 }
  0x70   : > { %801 = vrot.lane.b32.xlu1 %v680_v7, %s3468_s8  ;;  %1136 = vrot.lane.b32.xlu0 %v874_v14, %s3474_s18 }
  0x74   : > { %803 = vrot.lane.b32.xlu1 %v692_v25, %s3468_s8  ;;  %1138 = vrot.lane.b32.xlu0 %v877_v35, %s3474_s18 }
  0x78   : > { %916 = vrot.lane.b32.xlu1 %v877_v35, %s3467_s30  ;;  %914 = vrot.lane.b32.xlu0 %v874_v14, %s3467_s30 }
  0x7c   : > { %949 = vrot.lane.b32.xlu1 %v3709_v30, %s3469_s9  ;;  %947 = vrot.lane.b32.xlu0 %v3680_v5, %s3469_s9 }
  0x7e   : > { %v903_v59 = vpop.permute.xlu1 %902 }
  0x80   : > { %993 = vrot.lane.b32.xlu1 %v704_v48, %s3472_s16  ;;  %991 = vrot.lane.b32.xlu0 %v692_v25, %s3472_s16  ;;  %v468_v25 = vshll.u32 %v300_v4, 16 }
  0x82   : > { %v790_v60 = vpop.permute.xlu0 %789  ;;  %v470_v37 = vor.u32 %v468_v25, %v467_v24 }
  0x83   : > { %v1162_v34 = vsel %vm1160_vm6, %v3530_v3, %v790_v60 }
  0x84   : > { %1029 = vrot.lane.b32.xlu1 %v880_v54, %s3471_s15  ;;  %1027 = vrot.lane.b32.xlu0 %v877_v35, %s3471_s15  ;;  %v3782_v40 = vsel %vm1193_vm7, %v1162_v34, %v903_v59  ;;  %v3789_v47 = vsel %vm3524_vm2, 0, %v470_v37  ;;  %v561_v59 = vsel %vm3524_vm2, %v467_v24, 0  ;;  %v475_v24 = vshll.u32 %v302_v49, 16 }
  0x85   : > { %v732_v56 = vshll.u32 %v3789_v47, 16  ;;  %v730_v63 = vshrl.u32 %v3789_v47, 16  ;;  %v737_v4 = vshll.u32 %v561_v59, 16  ;;  %v887_v34 = vrot.slane %v3789_v47, 1 }
  0x86   : > { %v477_v28 = vor.u32 %v475_v24, %v474_v23 }
  0x87   : > { %v734_v1 = vrot.slane %v732_v56, 1  ;;  %v739_v18 = vrot.slane %v737_v4, 1 }
  0x88   : > { %1062 = vrot.lane.b32.xlu1 %v3724_v46, %s3470_s12  ;;  %1060 = vrot.lane.b32.xlu0 %v3709_v30, %s3470_s12 }
  0x8a   : > { %v938_v7 = vpop.permute.xlu1 %937  ;;  %v936_v8 = vpop.permute.xlu0 %935 }
  0x8b   : > { %v1228_v43 = vsel %vm1226_vm8, %v3782_v40, %v936_v8 }
  0x8c   : > { %1106 = vrot.lane.b32.xlu1 %v3748_v6, %s3473_s17  ;;  %1104 = vrot.lane.b32.xlu0 %v704_v48, %s3473_s17 }
  0x8e   : > { %v3754_v14 = vpop.permute.xlu1 %1050  ;;  %v1049_v15 = vpop.permute.xlu0 %1048 }
  0x90   : > { %805 = vrot.lane.b32.xlu1 %v704_v48, %s3468_s8  ;;  %1140 = vrot.lane.b32.xlu0 %v880_v54, %s3474_s18 }
  0x92   : > { %v1016_v21 = vpop.permute.xlu0 %1015  ;;  %v905_v22 = vpop.permute.xlu1 %904 }
  0x94   : > { %807 = vrot.lane.b32.xlu1 %v3748_v6, %s3468_s8  ;;  %1142 = vrot.lane.b32.xlu0 %v3763_v19, %s3474_s18 }
  0x96   : > { %v1018_v35 = vpop.permute.xlu1 %1017  ;;  %v792_v36 = vpop.permute.xlu0 %791 }
  0x97   : > { %v1164_v38 = vsel %vm1160_vm6, %v3566_v32, %v792_v36 }
  0x98   : > { %v1197_v39 = vsel %vm1193_vm7, %v1164_v38, %v905_v22  ;;  %920 = vrot.lane.b32.xlu1 %v3763_v19, %s3467_s30  ;;  %918 = vrot.lane.b32.xlu0 %v880_v54, %s3467_s30  ;;  %v728_v54 = vsel %vm596_vm4, %v723_v41, %v727_v42  ;;  %v3833_v38 = vsel %vm3524_vm2, 0, %v477_v28 }
  0x99   : > { %v1230_v32 = vsel %vm1226_vm8, %v1197_v39, %v938_v7  ;;  %v744_v42 = vshll.u32 %v3833_v38, 16  ;;  %v742_v49 = vshrl.u32 %v3833_v38, 16 }
  0x9a   : > { %v982_v44 = vpop.permute.xlu1 %981  ;;  %v980_v45 = vpop.permute.xlu0 %979 }
  0x9b   : > { %v1261_v48 = vsel %vm1259_vm9, %v1228_v43, %v980_v45  ;;  %v1263_v52 = vsel %vm1259_vm9, %v1230_v32, %v982_v44  ;;  %v562_v32 = vsel %vm3524_vm2, %v474_v23, 0 }
  0x9c   : > { %v1294_v50 = vsel %vm1292_vm10, %v1261_v48, %v1016_v21  ;;  %953 = vrot.lane.b32.xlu1 %v3758_v16, %s3469_s9  ;;  %951 = vrot.lane.b32.xlu0 %v3724_v46, %s3469_s9  ;;  %v1296_v61 = vsel %vm1292_vm10, %v1263_v52, %v1018_v35  ;;  %v888_v35 = vrot.slane %v561_v59, 1  ;;  %v749_v51 = vshll.u32 %v562_v32, 16 }
  0x9d   : > { %v1327_v60 = vsel %vm1325_vm11, %v1294_v50, %v1049_v15  ;;  %v1329_v12 = vsel %vm1325_vm11, %v1296_v61, %v3754_v14  ;;  %v304_v14 = vld [vmem:[%s3546_s29 + $0x60] sm:$0xff]   ;;  %v746_v50 = vrot.slane %v744_v42, 1  ;;  %v306_v61 = vld [vmem:[%s3546_s29 + $0x68] sm:$0xff]  }
  0x9e   : > { %v1095_v57 = vpop.permute.xlu1 %1094  ;;  %v1093_v58 = vpop.permute.xlu0 %1092  ;;  %v479_v39 = vshrl.u32 %v304_v14, 16  ;;  %v889_v41 = vsel %vm853_vm3, %v887_v34, %v888_v35  ;;  %v482_v48 = vshll.u32 %v304_v14, 16  ;;  %v486_v34 = vshrl.u32 %v306_v61, 16 }
  0x9f   : > { %v1360_v7 = vsel %vm1358_vm12, %v1327_v60, %v1093_v58  ;;  %v1362_v20 = vsel %vm1358_vm12, %v1329_v12, %v1095_v57  ;;  %v747_v56 = vor.u32 %v746_v50, %v742_v49  ;;  %v751_v57 = vrot.slane %v749_v51, 1  ;;  %v308_v49 = vld [vmem:[%s3546_s29 + $0x70] sm:$0xff]  }
  0xa0   : > { %997 = vrot.lane.b32.xlu1 %v728_v54, %s3472_s16  ;;  %995 = vrot.lane.b32.xlu0 %v3748_v6, %s3472_s16  ;;  %v735_v6 = vor.u32 %v734_v1, %v730_v63  ;;  %v481_v45 = vrot.slane %v479_v39, 7  ;;  %v891_v1 = vrot.slane %v562_v32, 1 }
  0xa2   : > { %v794_v8 = vpop.permute.xlu1 %793  ;;  %v1129_v9 = vpop.permute.xlu0 %1128  ;;  %v484_v55 = vor.u32 %v482_v48, %v481_v45 }
  0xa3   : > { %v1393_v15 = vsel %vm1391_vm13, %v1360_v7, %v1129_v9  ;;  %v1166_v63 = vsel %vm1160_vm6, %v3562_v31, %v794_v8  ;;  %v752_v7 = vsel %vm596_vm4, %v747_v56, %v751_v57  ;;  %v563_v9 = vsel %vm3524_vm2, %v481_v45, 0 }
  0xa4   : > { %1033 = vrot.lane.b32.xlu1 %v886_v62, %s3471_s15  ;;  %1031 = vrot.lane.b32.xlu0 %v3763_v19, %s3471_s15  ;;  %v740_v19 = vsel %vm596_vm4, %v735_v6, %v739_v18  ;;  %v3848_v60 = vsel %vm3524_vm2, 0, %v484_v55  ;;  %v488_v45 = vrot.slane %v486_v34, 7  ;;  %v894_v55 = vrot.slane %v563_v9, 1 }
  0xa5   : > { %3313 = vmatprep.mubr.msk.bf16.mxu0 %vm1444_vm14, %v1393_v15  ;;  %v756_v11 = vshll.u32 %v3848_v60, 16 }
  0xa6   : > { %v796_v21 = vpop.permute.xlu1 %795  ;;  %v1131_v22 = vpop.permute.xlu0 %1130 }
  0xa7   : > { %v1395_v25 = vsel %vm1391_vm13, %v1362_v20, %v1131_v22  ;;  %v1168_v31 = vsel %vm1160_vm6, %v3574_v33, %v796_v21  ;;  %v761_v22 = vshll.u32 %v563_v9, 16  ;;  %v754_v33 = vshrl.u32 %v3848_v60, 16 }
  0xa8   : > { %1066 = vrot.lane.b32.xlu1 %v3789_v47, %s3470_s12  ;;  %1064 = vrot.lane.b32.xlu0 %v3758_v16, %s3470_s12  ;;  %v758_v21 = vrot.slane %v756_v11, 1  ;;  %v496_v11 = vshll.u32 %v308_v49, 16 }
  0xa9   : > { %3314 = vmatmul.mubr.msk.bf16.vlgmr.msra.gmra.mrb[0].mxu0 %vm1444_vm14, %v1395_v25  ;;  %v763_v39 = vrot.slane %v761_v22, 1 }
  0xaa   : > { %v909_v26 = vpop.permute.xlu1 %908  ;;  %v907_v27 = vpop.permute.xlu0 %906 }
  0xab   : > { %v1199_v4 = vsel %vm1193_vm7, %v1166_v63, %v907_v27  ;;  %v1201_v23 = vsel %vm1193_vm7, %v1168_v31, %v909_v26 }
  0xac   : > { %1110 = vrot.lane.b32.xlu1 %v740_v19, %s3473_s17  ;;  %1108 = vrot.lane.b32.xlu0 %v728_v54, %s3473_s17 }
  0xae   : > { %v942_v36 = vpop.permute.xlu1 %941  ;;  %v940_v37 = vpop.permute.xlu0 %939 }
  0xaf   : > { %v1232_v8 = vsel %vm1226_vm8, %v1199_v4, %v940_v37  ;;  %v1234_v25 = vsel %vm1226_vm8, %v1201_v23, %v942_v36  ;;  %v759_v36 = vor.u32 %v758_v21, %v754_v33  ;;  %v564_v4 = vsel %vm3524_vm2, %v488_v45, 0  ;;  %v310_v21 = vld [vmem:[%s3546_s29 + $0x78] sm:$0xff]  }
  0xb0   : > { %809 = vrot.lane.b32.xlu1 %v728_v54, %s3468_s8  ;;  %1144 = vrot.lane.b32.xlu0 %v886_v62, %s3474_s18 }
  0xb2   : > { %v986_v43 = vpop.permute.xlu1 %985  ;;  %v984_v44 = vpop.permute.xlu0 %983 }
  0xb3   : > { %v1265_v6 = vsel %vm1259_vm9, %v1232_v8, %v984_v44  ;;  %v773_v8 = vshll.u32 %v564_v4, 16 }
  0xb4   : > { %811 = vrot.lane.b32.xlu1 %v740_v19, %s3468_s8  ;;  %1146 = vrot.lane.b32.xlu0 %v889_v41, %s3474_s18 }
  0xb5   : > { %v775_v22 = vrot.slane %v773_v8, 1 }
  0xb6   : > { %v1022_v52 = vpop.permute.xlu1 %1021  ;;  %v1020_v54 = vpop.permute.xlu0 %1019 }
  0xb7   : > { %v1298_v18 = vsel %vm1292_vm10, %v1265_v6, %v1020_v54  ;;  %v893_v54 = vrot.slane %v3848_v60, 1 }
  0xb8   : > { %924 = vrot.lane.b32.xlu1 %v889_v41, %s3467_s30  ;;  %922 = vrot.lane.b32.xlu0 %v886_v62, %s3467_s30  ;;  %v890_v62 = vrot.slane %v3833_v38, 1 }
  0xba   : > { %v1055_v58 = vpop.permute.xlu1 %1054  ;;  %v1053_v59 = vpop.permute.xlu0 %1052  ;;  %v892_v20 = vsel %vm853_vm3, %v890_v62, %v891_v1 }
  0xbb   : > { %v1331_v24 = vsel %vm1325_vm11, %v1298_v18, %v1053_v59  ;;  %v493_v59 = vshrl.u32 %v308_v49, 16 }
  0xbc   : > { %957 = vrot.lane.b32.xlu1 %v3833_v38, %s3469_s9  ;;  %955 = vrot.lane.b32.xlu0 %v3789_v47, %s3469_s9 }
  0xbd   : > { %v495_v9 = vrot.slane %v493_v59, 7 }
  0xbe   : > { %v1099_v12 = vpop.permute.xlu1 %1098  ;;  %v1097_v15 = vpop.permute.xlu0 %1096 }
  0xbf   : > { %v1364_v14 = vsel %vm1358_vm12, %v1331_v24, %v1097_v15  ;;  %v498_v6 = vor.u32 %v496_v11, %v495_v9 }
  0xc0   : > { %1001 = vrot.lane.b32.xlu1 %v752_v7, %s3472_s16  ;;  %999 = vrot.lane.b32.xlu0 %v740_v19, %s3472_s16  ;;  %v1267_v19 = vsel %vm1259_vm9, %v1234_v25, %v986_v43  ;;  %v489_v43 = vshll.u32 %v306_v61, 16  ;;  %v895_v61 = vsel %vm853_vm3, %v893_v54, %v894_v55  ;;  %v572_v54 = vshrl.u32 %v310_v21, 16 }
  0xc1   : > { %v1300_v37 = vsel %vm1292_vm10, %v1267_v19, %v1022_v52  ;;  %v3912_v33 = vsel %vm3524_vm2, 0, %v498_v6 }
  0xc2   : > { %v798_v27 = vpop.permute.xlu1 %797  ;;  %v1133_v28 = vpop.permute.xlu0 %1132  ;;  %v1333_v26 = vsel %vm1325_vm11, %v1300_v37, %v1055_v58  ;;  %v491_v52 = vor.u32 %v489_v43, %v488_v45  ;;  %v780_v19 = vshll.u32 %v3912_v33, 16 }
  0xc3   : > { %v1397_v35 = vsel %vm1391_vm13, %v1364_v14, %v1133_v28  ;;  %v1366_v42 = vsel %vm1358_vm12, %v1333_v26, %v1099_v12  ;;  %v1170_v25 = vsel %vm1160_vm6, %v3616_v13, %v798_v27  ;;  %v897_v14 = vrot.slane %v564_v4, 1 }
  0xc4   : > { %1037 = vrot.lane.b32.xlu1 %v892_v20, %s3471_s15  ;;  %1035 = vrot.lane.b32.xlu0 %v889_v41, %s3471_s15  ;;  %v764_v41 = vsel %vm596_vm4, %v759_v36, %v763_v39  ;;  %v3897_v58 = vsel %vm3524_vm2, 0, %v491_v52  ;;  %v565_v26 = vsel %vm3524_vm2, %v495_v9, 0  ;;  %v782_v45 = vrot.slane %v780_v19, 1 }
  0xc5   : > { %3317 = vmatprep.mubr.msk.bf16.mxu0 %vm1444_vm14, %v1397_v35  ;;  %v768_v63 = vshll.u32 %v3897_v58, 16  ;;  %v785_v43 = vshll.u32 %v565_v26, 16  ;;  %v574_v9 = vrot.slane %v572_v54, 7  ;;  %v900_v6 = vrot.slane %v565_v26, 1 }
  0xc6   : > { %v800_v44 = vpop.permute.xlu1 %799  ;;  %v1135_v32 = vpop.permute.xlu0 %1134 }
  0xc7   : > { %v1399_v48 = vsel %vm1391_vm13, %v1366_v42, %v1135_v32  ;;  %v770_v31 = vrot.slane %v768_v63, 1  ;;  %v1172_v35 = vsel %vm1160_vm6, %v3636_v29, %v800_v44  ;;  %v778_v32 = vshrl.u32 %v3912_v33, 16 }
  0xc8   : > { %1070 = vrot.lane.b32.xlu1 %v3848_v60, %s3470_s12  ;;  %1068 = vrot.lane.b32.xlu0 %v3833_v38, %s3470_s12  ;;  %v787_v59 = vrot.slane %v785_v43, 1 }
  0xc9   : > { %3318 = vmatmul.mubr.msk.bf16.gmra.mrb[4].mxu0 %vm1444_vm14, %v1399_v48 }
  0xca   : > { %v913_v50 = vpop.permute.xlu1 %912  ;;  %v911_v51 = vpop.permute.xlu0 %910 }
  0xcb   : > { %v1203_v28 = vsel %vm1193_vm7, %v1170_v25, %v911_v51  ;;  %v1205_v29 = vsel %vm1193_vm7, %v1172_v35, %v913_v50 }
  0xcc   : > { %1114 = vrot.lane.b32.xlu1 %v764_v41, %s3473_s17  ;;  %1112 = vrot.lane.b32.xlu0 %v752_v7, %s3473_s17 }
  0xce   : > { %v946_v56 = vpop.permute.xlu1 %945  ;;  %v944_v57 = vpop.permute.xlu0 %943 }
  0xcf   : > { %v1236_v13 = vsel %vm1226_vm8, %v1203_v28, %v944_v57  ;;  %v1238_v48 = vsel %vm1226_vm8, %v1205_v29, %v946_v56  ;;  %v783_v56 = vor.u32 %v782_v45, %v778_v32 }
  0xd0   : > { %813 = vrot.lane.b32.xlu1 %v752_v7, %s3468_s8  ;;  %1148 = vrot.lane.b32.xlu0 %v892_v20, %s3474_s18  ;;  %v766_v7 = vshrl.u32 %v3897_v58, 16 }
  0xd2   : > { %v990_v62 = vpop.permute.xlu1 %989  ;;  %v988_v1 = vpop.permute.xlu0 %987  ;;  %v771_v18 = vor.u32 %v770_v31, %v766_v7 }
  0xd3   : > { %v1269_v36 = vsel %vm1259_vm9, %v1236_v13, %v988_v1  ;;  %v1271_v55 = vsel %vm1259_vm9, %v1238_v48, %v990_v62  ;;  %v575_v62 = vshll.u32 %v310_v21, 16 }
  0xd4   : > { %815 = vrot.lane.b32.xlu1 %v764_v41, %s3468_s8  ;;  %1150 = vrot.lane.b32.xlu0 %v895_v61, %s3474_s18  ;;  %v776_v34 = vsel %vm596_vm4, %v771_v18, %v775_v22 }
  0xd5   : > { %v577_v8 = vor.u32 %v575_v62, %v574_v9 }
  0xd6   : > { %v1026_v12 = vpop.permute.xlu1 %1025  ;;  %v1024_v15 = vpop.permute.xlu0 %1023 }
  0xd7   : > { %v1302_v39 = vsel %vm1292_vm10, %v1269_v36, %v1024_v15  ;;  %v1304_v57 = vsel %vm1292_vm10, %v1271_v55, %v1026_v12  ;;  %v3222_v12 = vcombine.low %v3466_v0, %v3466_v0  ;;  %v899_v15 = vrot.slane %v3912_v33, 1 }
  0xd8   : > { %928 = vrot.lane.b32.xlu1 %v895_v61, %s3467_s30  ;;  %926 = vrot.lane.b32.xlu0 %v892_v20, %s3467_s30  ;;  %v896_v20 = vrot.slane %v3897_v58, 1 }
  0xd9   : > { %v901_v0 = vsel %vm853_vm3, %v899_v15, %v900_v6  ;;  %v589_v19 = vshll.u32 %v3222_v12, 16 }
  0xda   : > { %v1059_v23 = vpop.permute.xlu1 %1058  ;;  %v1057_v24 = vpop.permute.xlu0 %1056  ;;  %v898_v42 = vsel %vm853_vm3, %v896_v20, %v897_v14  ;;  %v581_v14 = vsel %vm3524_vm2, %v574_v9, 0 }
  0xdb   : > { %v1335_v44 = vsel %vm1325_vm11, %v1302_v39, %v1057_v24  ;;  %v1337_v50 = vsel %vm1325_vm11, %v1304_v57, %v1059_v23  ;;  %v3962_v23 = vsel %vm3524_vm2, 0, %v577_v8  ;;  %v586_v24 = vshrl.u32 %v3222_v12, 16 }
  0xdc   : > { %961 = vrot.lane.b32.xlu1 %v3897_v58, %s3469_s9  ;;  %959 = vrot.lane.b32.xlu0 %v3848_v60, %s3469_s9  ;;  %v970_v21 = vshll.u32 %v3962_v23, 16  ;;  %v968_v35 = vshrl.u32 %v3962_v23, 16  ;;  %v975_v13 = vshll.u32 %v581_v14, 16  ;;  %v1012_v43 = vrot.slane %v3962_v23, 1 }
  0xdd   : > { %v588_v28 = vrot.slane %v586_v24, 7  ;;  %v1013_v48 = vrot.slane %v581_v14, 1 }
  0xde   : > { %v1103_v27 = vpop.permute.xlu1 %1102  ;;  %v1101_v37 = vpop.permute.xlu0 %1100  ;;  %v977_v39 = vrot.slane %v975_v13, 1 }
  0xdf   : > { %v1368_v49 = vsel %vm1358_vm12, %v1335_v44, %v1101_v37  ;;  %v1370_v63 = vsel %vm1358_vm12, %v1337_v50, %v1103_v27  ;;  %v591_v26 = vor.u32 %v589_v19, %v588_v28 }
  0xe0   : > { %1005 = vrot.lane.b32.xlu1 %v776_v34, %s3472_s16  ;;  %1003 = vrot.lane.b32.xlu0 %v764_v41, %s3472_s16 }
  0xe1   : > { %v594_v44 = vsel %vm3524_vm2, 0, %v591_v26 }
  0xe2   : > { %v802_v51 = vpop.permute.xlu1 %801  ;;  %v1137_v52 = vpop.permute.xlu0 %1136 }
  0xe3   : > { %v1401_v41 = vsel %vm1391_vm13, %v1368_v49, %v1137_v52  ;;  %v1174_v45 = vsel %vm1160_vm6, %v3665_v53, %v802_v51  ;;  %v1083_v52 = vshll.u32 %v594_v44, 16 }
  0xe4   : > { %1041 = vrot.lane.b32.xlu1 %v898_v42, %s3471_s15  ;;  %1039 = vrot.lane.b32.xlu0 %v895_v61, %s3471_s15  ;;  %v788_v61 = vsel %vm596_vm4, %v783_v56, %v787_v59  ;;  %v1014_v56 = vsel %vm853_vm3, %v1012_v43, %v1013_v48  ;;  %v1081_v59 = vshrl.u32 %v594_v44, 16 }
  0xe5   : > { %3321 = vmatprep.mubr.msk.bf16.mxu0 %vm1444_vm14, %v1401_v41  ;;  %v595_v41 = vsel %vm3524_vm2, %v588_v28, 0 }
  0xe6   : > { %v804_v1 = vpop.permute.xlu1 %803  ;;  %v1139_v4 = vpop.permute.xlu0 %1138 }
  0xe7   : > { %v1403_v11 = vsel %vm1391_vm13, %v1370_v63, %v1139_v4  ;;  %v1176_v54 = vsel %vm1160_vm6, %v3680_v5, %v804_v1  ;;  %v1085_v1 = vrot.slane %v1083_v52, 1  ;;  %v1088_v4 = vshll.u32 %v595_v41, 16 }
  0xe8   : > { %1074 = vrot.lane.b32.xlu1 %v3912_v33, %s3470_s12  ;;  %1072 = vrot.lane.b32.xlu0 %v3897_v58, %s3470_s12 }
  0xe9   : > { %3322 = vmatmul.mubr.msk.bf16.gmra.mrb[8].mxu0 %vm1444_vm14, %v1403_v11  ;;  %v1086_v15 = vor.u32 %v1085_v1, %v1081_v59  ;;  %v1090_v6 = vrot.slane %v1088_v4, 1 }
  0xea   : > { %v917_v7 = vpop.permute.xlu1 %916  ;;  %v915_v31 = vpop.permute.xlu0 %914 }
  0xeb   : > { %v1209_v5 = vsel %vm1193_vm7, %v1176_v54, %v917_v7 }
  0xec   : > { %1118 = vrot.lane.b32.xlu1 %v788_v61, %s3473_s17  ;;  %1116 = vrot.lane.b32.xlu0 %v776_v34, %s3473_s17 }
  0xee   : > { %v950_v18 = vpop.permute.xlu1 %949  ;;  %v948_v22 = vpop.permute.xlu0 %947 }
  0xef   : > { %v1242_v9 = vsel %vm1226_vm8, %v1209_v5, %v950_v18 }
  0xf0   : > { %817 = vrot.lane.b32.xlu1 %v776_v34, %s3468_s8  ;;  %1152 = vrot.lane.b32.xlu0 %v898_v42, %s3474_s18  ;;  %v972_v34 = vrot.slane %v970_v21, 1 }
  0xf2   : > { %v994_v25 = vpop.permute.xlu1 %993  ;;  %v992_v20 = vpop.permute.xlu0 %991  ;;  %v973_v36 = vor.u32 %v972_v34, %v968_v35 }
  0xf3   : > { %v1275_v8 = vsel %vm1259_vm9, %v1242_v9, %v994_v25  ;;  %v1125_v25 = vrot.slane %v594_v44, 1 }
  0xf4   : > { %819 = vrot.lane.b32.xlu1 %v788_v61, %s3468_s8  ;;  %1154 = vrot.lane.b32.xlu0 %v901_v0, %s3474_s18  ;;  %v978_v49 = vsel %vm596_vm4, %v973_v36, %v977_v39 }
  0xf6   : > { %v1030_v27 = vpop.permute.xlu1 %1029  ;;  %v1028_v37 = vpop.permute.xlu0 %1027 }
  0xf8   : > { %932 = vrot.lane.b32.xlu1 %v901_v0, %s3467_s30  ;;  %930 = vrot.lane.b32.xlu0 %v898_v42, %s3467_s30  ;;  %v1207_v42 = vsel %vm1193_vm7, %v1174_v45, %v915_v31 }
  0xf9   : > { %v1240_v55 = vsel %vm1226_vm8, %v1207_v42, %v948_v22 }
  0xfa   : > { %v1063_v32 = vpop.permute.xlu1 %1062  ;;  %v1061_v29 = vpop.permute.xlu0 %1060  ;;  %v1273_v57 = vsel %vm1259_vm9, %v1240_v55, %v992_v20  ;;  %v1126_v20 = vrot.slane %v595_v41, 1 }
  0xfb   : > { %v1306_v50 = vsel %vm1292_vm10, %v1273_v57, %v1028_v37 }
  0xfc   : > { %965 = vrot.lane.b32.xlu1 %v3962_v23, %s3469_s9  ;;  %963 = vrot.lane.b32.xlu0 %v3912_v33, %s3469_s9  ;;  %v1339_v63 = vsel %vm1325_vm11, %v1306_v50, %v1061_v29  ;;  %v1127_v19 = vsel %vm853_vm3, %v1125_v25, %v1126_v20 }
  0xfe   : > { %v1107_v53 = vpop.permute.xlu1 %1106  ;;  %v1105_v51 = vpop.permute.xlu0 %1104 }
  0xff   : > { %v1372_v62 = vsel %vm1358_vm12, %v1339_v63, %v1105_v51 }
 0x100   : > { %1009 = vrot.lane.b32.xlu1 %v978_v49, %s3472_s16  ;;  %1007 = vrot.lane.b32.xlu0 %v788_v61, %s3472_s16  ;;  %v1308_v61 = vsel %vm1292_vm10, %v1275_v8, %v1030_v27 }
 0x101   : > { %v1341_v7 = vsel %vm1325_vm11, %v1308_v61, %v1063_v32 }
 0x102   : > { %v806_v11 = vpop.permute.xlu1 %805  ;;  %v1141_v31 = vpop.permute.xlu0 %1140  ;;  %v1374_v18 = vsel %vm1358_vm12, %v1341_v7, %v1107_v53 }
 0x103   : > { %v1405_v12 = vsel %vm1391_vm13, %v1372_v62, %v1141_v31  ;;  %v1178_v39 = vsel %vm1160_vm6, %v3709_v30, %v806_v11 }
 0x104   : > { %1045 = vrot.lane.b32.xlu1 %v1014_v56, %s3471_s15  ;;  %1043 = vrot.lane.b32.xlu0 %v901_v0, %s3471_s15  ;;  %v1091_v0 = vsel %vm596_vm4, %v1086_v15, %v1090_v6 }
 0x105   : > { %3325 = vmatprep.mubr.msk.bf16.mxu0 %vm1444_vm14, %v1405_v12 }
 0x106   : > { %v808_v22 = vpop.permute.xlu1 %807  ;;  %v1143_v24 = vpop.permute.xlu0 %1142 }
 0x107   : > { %v1407_v21 = vsel %vm1391_vm13, %v1374_v18, %v1143_v24  ;;  %v1180_v29 = vsel %vm1160_vm6, %v3724_v46, %v808_v22 }
 0x108   : > { %1078 = vrot.lane.b32.xlu1 %v594_v44, %s3470_s12  ;;  %1076 = vrot.lane.b32.xlu0 %v3962_v23, %s3470_s12 }
 0x109   : > { %3326 = vmatmul.mubr.msk.bf16.gmra.mrb[12].mxu0 %vm1444_vm14, %v1407_v21 }
 0x10a   : > { %v921_v14 = vpop.permute.xlu1 %920  ;;  %v919_v28 = vpop.permute.xlu0 %918 }
 0x10b   : > { %v1211_v32 = vsel %vm1193_vm7, %v1178_v39, %v919_v28 }
 0x10c   : > { %1122 = vrot.lane.b32.xlu1 %v1091_v0, %s3473_s17  ;;  %1120 = vrot.lane.b32.xlu0 %v978_v49, %s3473_s17  ;;  %v1213_v49 = vsel %vm1193_vm7, %v1180_v29, %v921_v14 }
 0x10e   : > { %v954_v35 = vpop.permute.xlu1 %953  ;;  %v952_v34 = vpop.permute.xlu0 %951 }
 0x10f   : > { %v1244_v44 = vsel %vm1226_vm8, %v1211_v32, %v952_v34  ;;  %v1246_v54 = vsel %vm1226_vm8, %v1213_v49, %v954_v35 }
 0x110   : > { %1158 = vrot.lane.b32.xlu1 %v1127_v19, %s3474_s18  ;;  %1156 = vrot.lane.b32.xlu0 %v1014_v56, %s3474_s18 }
 0x112   : > { %v998_v23 = vpop.permute.xlu1 %997  ;;  %v996_v13 = vpop.permute.xlu0 %995 }
 0x113   : > { %v1277_v48 = vsel %vm1259_vm9, %v1244_v44, %v996_v13  ;;  %v1279_v46 = vsel %vm1259_vm9, %v1246_v54, %v998_v23 }
 0x116   : > { %v1034_v27 = vpop.permute.xlu1 %1033  ;;  %v1032_v37 = vpop.permute.xlu0 %1031 }
 0x117   : > { %v1310_v42 = vsel %vm1292_vm10, %v1277_v48, %v1032_v37  ;;  %v1312_v41 = vsel %vm1292_vm10, %v1279_v46, %v1034_v27 }
 0x11a   : > { %v1067_v26 = vpop.permute.xlu1 %1066  ;;  %v1065_v36 = vpop.permute.xlu0 %1064 }
 0x11b   : > { %v1343_v52 = vsel %vm1325_vm11, %v1310_v42, %v1065_v36  ;;  %v1345_v57 = vsel %vm1325_vm11, %v1312_v41, %v1067_v26 }
 0x11e   : > { %v1111_v45 = vpop.permute.xlu1 %1110  ;;  %v1109_v43 = vpop.permute.xlu0 %1108 }
 0x11f   : > { %v1376_v30 = vsel %vm1358_vm12, %v1343_v52, %v1109_v43  ;;  %v1378_v50 = vsel %vm1358_vm12, %v1345_v57, %v1111_v45 }
 0x122   : > { %v810_v55 = vpop.permute.xlu1 %809  ;;  %v1145_v53 = vpop.permute.xlu0 %1144 }
 0x123   : > { %v1409_v51 = vsel %vm1391_vm13, %v1376_v30, %v1145_v53  ;;  %v1182_v7 = vsel %vm1160_vm6, %v3758_v16, %v810_v55 }
 0x124   : > { %3329 = vmatprep.mubr.msk.bf16.mxu0 %vm1444_vm14, %v1409_v51 }
 0x126   : > { %v812_v56 = vpop.permute.xlu1 %811  ;;  %v1147_v59 = vpop.permute.xlu0 %1146 }
 0x127   : > { %v1411_v5 = vsel %vm1391_vm13, %v1378_v50, %v1147_v59  ;;  %v1184_v6 = vsel %vm1160_vm6, %v3789_v47, %v812_v56 }
 0x128   : > { %3330 = vmatmul.mubr.msk.bf16.gmra.mrb[16].mxu0 %vm1444_vm14, %v1411_v5 }
 0x12a   : > { %v925_v63 = vpop.permute.xlu1 %924  ;;  %v923_v1 = vpop.permute.xlu0 %922 }
 0x12b   : > { %v1215_v15 = vsel %vm1193_vm7, %v1182_v7, %v923_v1  ;;  %v1217_v0 = vsel %vm1193_vm7, %v1184_v6, %v925_v63 }
 0x12e   : > { %v958_v4 = vpop.permute.xlu1 %957  ;;  %v956_v9 = vpop.permute.xlu0 %955 }
 0x12f   : > { %v1248_v18 = vsel %vm1226_vm8, %v1215_v15, %v956_v9  ;;  %v1250_v14 = vsel %vm1226_vm8, %v1217_v0, %v958_v4  ;;  %v4084_v0 = vld [vmem:[%s4941_s2] ss:$0 sm:$0xff] }
 0x132   : > { %v1002_v62 = vpop.permute.xlu1 %1001  ;;  %v1000_v11 = vpop.permute.xlu0 %999 }
 0x133   : > { %v1281_v21 = vsel %vm1259_vm9, %v1248_v18, %v1000_v11  ;;  %v1283_v47 = vsel %vm1259_vm9, %v1250_v14, %v1002_v62  ;;  %v4089_v14 = vld [vmem:[%s4942_s3] ss:$0 sm:$0xff] }
 0x136   : > { %v1038_v31 = vpop.permute.xlu1 %1037  ;;  %v1036_v8 = vpop.permute.xlu0 %1035 }
 0x137   : > { %v1314_v25 = vsel %vm1292_vm10, %v1281_v21, %v1036_v8  ;;  %v1316_v34 = vsel %vm1292_vm10, %v1283_v47, %v1038_v31 }
 0x13a   : > { %v1071_v12 = vpop.permute.xlu1 %1070  ;;  %v1069_v61 = vpop.permute.xlu0 %1068 }
 0x13b   : > { %v1347_v20 = vsel %vm1325_vm11, %v1314_v25, %v1069_v61  ;;  %v1349_v23 = vsel %vm1325_vm11, %v1316_v34, %v1071_v12 }
 0x13e   : > { %v1115_v22 = vpop.permute.xlu1 %1114  ;;  %v1113_v24 = vpop.permute.xlu0 %1112 }
 0x13f   : > { %v1380_v16 = vsel %vm1358_vm12, %v1347_v20, %v1113_v24  ;;  %v1382_v13 = vsel %vm1358_vm12, %v1349_v23, %v1115_v22 }
 0x142   : > { %v814_v28 = vpop.permute.xlu1 %813  ;;  %v1149_v19 = vpop.permute.xlu0 %1148 }
 0x143   : > { %v1413_v35 = vsel %vm1391_vm13, %v1380_v16, %v1149_v19  ;;  %v1186_v52 = vsel %vm1160_vm6, %v3833_v38, %v814_v28 }
 0x144   : > { %3333 = vmatprep.mubr.msk.bf16.mxu0 %vm1444_vm14, %v1413_v35 }
 0x146   : > { %v816_v27 = vpop.permute.xlu1 %815  ;;  %v1151_v37 = vpop.permute.xlu0 %1150 }
 0x147   : > { %v1415_v26 = vsel %vm1391_vm13, %v1382_v13, %v1151_v37  ;;  %v1188_v30 = vsel %vm1160_vm6, %v3848_v60, %v816_v27 }
 0x148   : > { %3334 = vmatmul.mubr.msk.bf16.gmra.mrb[20].mxu0 %vm1444_vm14, %v1415_v26 }
 0x14a   : > { %v929_v36 = vpop.permute.xlu1 %928  ;;  %v927_v39 = vpop.permute.xlu0 %926 }
 0x14b   : > { %v1219_v54 = vsel %vm1193_vm7, %v1186_v52, %v927_v39  ;;  %v1221_v57 = vsel %vm1193_vm7, %v1188_v30, %v929_v36 }
 0x14e   : > { %v962_v32 = vpop.permute.xlu1 %961  ;;  %v960_v29 = vpop.permute.xlu0 %959 }
 0x14f   : > { %v1252_v55 = vsel %vm1226_vm8, %v1219_v54, %v960_v29  ;;  %v1254_v56 = vsel %vm1226_vm8, %v1221_v57, %v962_v32 }
 0x152   : > { %v1006_v44 = vpop.permute.xlu1 %1005  ;;  %v1004_v45 = vpop.permute.xlu0 %1003 }
 0x153   : > { %v1285_v51 = vsel %vm1259_vm9, %v1252_v55, %v1004_v45  ;;  %v1287_v60 = vsel %vm1259_vm9, %v1254_v56, %v1006_v44 }
 0x156   : > { %v1042_v43 = vpop.permute.xlu1 %1041  ;;  %v1040_v48 = vpop.permute.xlu0 %1039 }
 0x157   : > { %v1318_v41 = vsel %vm1292_vm10, %v1285_v51, %v1040_v48  ;;  %v1320_v1 = vsel %vm1292_vm10, %v1287_v60, %v1042_v43 }
 0x15a   : > { %v1075_v42 = vpop.permute.xlu1 %1074  ;;  %v1073_v49 = vpop.permute.xlu0 %1072 }
 0x15b   : > { %v1351_v50 = vsel %vm1325_vm11, %v1318_v41, %v1073_v49  ;;  %v1353_v4 = vsel %vm1325_vm11, %v1320_v1, %v1075_v42 }
 0x15e   : > { %v1119_v53 = vpop.permute.xlu1 %1118  ;;  %v1117_v46 = vpop.permute.xlu0 %1116 }
 0x15f   : > { %v1384_v38 = vsel %vm1358_vm12, %v1351_v50, %v1117_v46  ;;  %v1386_v9 = vsel %vm1358_vm12, %v1353_v4, %v1119_v53 }
 0x162   : > { %v818_v59 = vpop.permute.xlu1 %817  ;;  %v1153_v5 = vpop.permute.xlu0 %1152 }
 0x163   : > { %v1417_v63 = vsel %vm1391_vm13, %v1384_v38, %v1153_v5  ;;  %v1190_v16 = vsel %vm1160_vm6, %v3897_v58, %v818_v59 }
 0x164   : > { %3337 = vmatprep.mubr.msk.bf16.mxu0 %vm1444_vm14, %v1417_v63 }
 0x166   : > { %v820_v62 = vpop.permute.xlu1 %819  ;;  %v1155_v11 = vpop.permute.xlu0 %1154 }
 0x167   : > { %v1419_v31 = vsel %vm1391_vm13, %v1386_v9, %v1155_v11  ;;  %v1192_v24 = vsel %vm1160_vm6, %v3912_v33, %v820_v62 }
 0x168   : > { %3338 = vmatmul.mubr.msk.bf16.gmra.mrb[24].mxu0 %vm1444_vm14, %v1419_v31 }
 0x16a   : > { %v933_v8 = vpop.permute.xlu1 %932  ;;  %v931_v12 = vpop.permute.xlu0 %930 }
 0x16b   : > { %v1225_v28 = vsel %vm1193_vm7, %v1192_v24, %v933_v8  ;;  %v1223_v47 = vsel %vm1193_vm7, %v1190_v16, %v931_v12 }
 0x16e   : > { %v966_v61 = vpop.permute.xlu1 %965  ;;  %v964_v7 = vpop.permute.xlu0 %963 }
 0x16f   : > { %v1258_v35 = vsel %vm1226_vm8, %v1225_v28, %v966_v61  ;;  %v1256_v27 = vsel %vm1226_vm8, %v1223_v47, %v964_v7 }
 0x172   : > { %v1010_v15 = vpop.permute.xlu1 %1009  ;;  %v1008_v6 = vpop.permute.xlu0 %1007 }
 0x173   : > { %v1291_v37 = vsel %vm1259_vm9, %v1258_v35, %v1010_v15  ;;  %v1289_v32 = vsel %vm1259_vm9, %v1256_v27, %v1008_v6 }
 0x176   : > { %v1046_v18 = vpop.permute.xlu1 %1045  ;;  %v1044_v22 = vpop.permute.xlu0 %1043 }
 0x177   : > { %v1324_v29 = vsel %vm1292_vm10, %v1291_v37, %v1046_v18  ;;  %v1322_v43 = vsel %vm1292_vm10, %v1289_v32, %v1044_v22 }
 0x17a   : > { %v1079_v21 = vpop.permute.xlu1 %1078  ;;  %v1077_v25 = vpop.permute.xlu0 %1076 }
 0x17b   : > { %v1357_v48 = vsel %vm1325_vm11, %v1324_v29, %v1079_v21  ;;  %v1355_v49 = vsel %vm1325_vm11, %v1322_v43, %v1077_v25 }
 0x17c   : > { %v3315_v20 = vpop.f32.mrb[0].mxu0 }
 0x17d   : > { %v1651_v33 = vmul.f32 %v3315_v20, %v4084_v0  ;;  %v1515_v19 = vpop.f32.mrb[1].mxu0 }
 0x17e   : > { %v1649_v34 = vmul.f32 %v4084_v0, %v1515_v19  ;;  %v3316_v23 = vpop.f32.mrb[2].mxu0  ;;  %v1123_v13 = vpop.permute.xlu1 %1122 }
 0x17f   : > { %v1690_v26 = vadd.f32 %v4089_v14, %v1651_v33  ;;  %v1652_v58 = vmul.f32 %v3316_v23, %v4084_v0  ;;  %v1518_v36 = vpop.f32.mrb[3].mxu0  ;;  %v1121_v39 = vpop.permute.xlu0 %1120  ;;  %v1390_v52 = vsel %vm1358_vm12, %v1357_v48, %v1123_v13 }
 0x180   : > { %v1688_v44 = vadd.f32 %v4089_v14, %v1649_v34  ;;  %v1650_v45 = vmul.f32 %v4084_v0, %v1518_v36  ;;  %v1388_v46 = vsel %vm1358_vm12, %v1355_v49, %v1121_v39 }
 0x181   : > { %v1691_v42 = vadd.f32 %v4089_v14, %v1652_v58  ;;  %v1722_v55 = vmax.f32 %v1690_v26, 0.0 }
 0x182   : > { %v1689_v54 = vadd.f32 %v4089_v14, %v1650_v45  ;;  %v1159_v30 = vpop.permute.xlu1 %1158  ;;  %v1720_v57 = vmax.f32 %v1688_v44, 0.0 }
 0x183   : > { %v1723_v53 = vmax.f32 %v1691_v42, 0.0  ;;  %v1423_v51 = vsel %vm1391_vm13, %v1390_v52, %v1159_v30  ;;  %v1157_v41 = vpop.permute.xlu0 %1156 }
 0x184   : > { %v1721_v50 = vmax.f32 %v1689_v54, 0.0  ;;  %v1421_v56 = vsel %vm1391_vm13, %v1388_v46, %v1157_v41 }
 0x185   : > { %v1753_v38 = vpack.c.bf16 %v1723_v53, %v1722_v55  ;;  %3341 = vmatprep.mubr.msk.bf16.mxu0 %vm1444_vm14, %v1421_v56 }
 0x186   : > { %v1752_v59 = vpack.c.bf16 %v1721_v50, %v1720_v57  ;;  %3342 = vmatmul.mubr.msk.bf16.gmra.mrb[28].mxu0 %vm1444_vm14, %v1423_v51 }
 0x187   : > { %v1776_v5 = vshrl.u32 %v1753_v38, 16  ;;  %v1779_v1 = vshll.u32 %v1753_v38, 16 }
 0x188   : > { %v1769_v60 = vshrl.u32 %v1752_v59, 16  ;;  %v1772_v9 = vshll.u32 %v1752_v59, 16 }
 0x189   : > { %v1778_v63 = vrot.slane %v1776_v5, 7  ;;  %v3421_v5 = vld [vmem:[%s4943_s4] sm:$0xff]  }
 0x18a   : > { %v1771_v4 = vrot.slane %v1769_v60, 7  ;;  %3345 = vmatprep.subr.bf16.mxu1 %v3421_v5 }
 0x18b   : > { %v1781_v62 = vor.u32 %v1779_v1, %v1778_v63  ;;  %v1919_v11 = vsel %vm3524_vm2, %v1778_v63, 0  ;;  %3346 = vmatpush3.bf16.msra.mxu1 %v3421_v5 }
 0x18c   : > { %v1774_v31 = vor.u32 %v1772_v9, %v1771_v4  ;;  %v2188_v61 = vrot.slane %v1919_v11, 1  ;;  %v1918_v18 = vsel %vm3524_vm2, %v1771_v4, 0  ;;  %v1964_v20 = vshll.u32 %v1919_v11, 16  ;;  %v3422_v11 = vld [vmem:[%s4943_s4 + $0x8] sm:$0xff]  }
 0x18d   : > { %v4121_v8 = vsel %vm3524_vm2, 0, %v1781_v62  ;;  %v2185_v21 = vrot.slane %v1918_v18, 1  ;;  %v1952_v32 = vshll.u32 %v1918_v18, 16  ;;  %3347 = vmatprep.subr.bf16.mxu1 %v3422_v11  ;;  %v3423_v18 = vld [vmem:[%s4943_s4 + $0x10] ss:$0 sps:$4 sm:$0x33]  }
 0x18e   : > { %2262 = vrot.lane.b32.xlu1 %v4121_v8, %s3469_s9  ;;  %2372 = vrot.lane.b32.xlu0 %v4121_v8, %s3470_s12  ;;  %v2187_v12 = vrot.slane %v4121_v8, 1  ;;  %v4130_v7 = vsel %vm3524_vm2, 0, %v1774_v31  ;;  %v1959_v15 = vshll.u32 %v4121_v8, 16  ;;  %v1957_v25 = vshrl.u32 %v4121_v8, 16 }
 0x18f   : > { %v2184_v22 = vrot.slane %v4130_v7, 1  ;;  %v1966_v33 = vrot.slane %v1964_v20, 1  ;;  %v1947_v47 = vshll.u32 %v4130_v7, 16  ;;  %v1945_v39 = vshrl.u32 %v4130_v7, 16  ;;  %3348 = vmatpush3.bf16.msra.mxu1 %v3422_v11 }
 0x190   : > { %v2189_v6 = vsel %vm853_vm3, %v2187_v12, %v2188_v61  ;;  %v1961_v24 = vrot.slane %v1959_v15, 1  ;;  %v1954_v52 = vrot.slane %v1952_v32, 1  ;;  %3384 = vmatprep.subr.msk.bf16.mxu1 %vm1477_vm5, %v3423_v18 }
 0x191   : > { %v2186_v16 = vsel %vm853_vm3, %v2184_v22, %v2185_v21  ;;  %v1949_v13 = vrot.slane %v1947_v47, 1 }
 0x192   : > { %2342 = vrot.lane.b32.xlu1 %v2189_v6, %s3471_s15  ;;  %2260 = vrot.lane.b32.xlu0 %v4130_v7, %s3469_s9  ;;  %v1962_v28 = vor.u32 %v1961_v24, %v1957_v25  ;;  %v2773_v25 = vsel %vm1477_vm5, %v3423_v18, 0 }
 0x193   : > { %v1950_v43 = vor.u32 %v1949_v13, %v1945_v39  ;;  %3350 = vmatpush3.bf16.msra.mxu1 %v2773_v25 }
 0x194   : > { %v1967_v19 = vsel %vm596_vm4, %v1962_v28, %v1966_v33 }
 0x195   : > { %v1955_v53 = vsel %vm596_vm4, %v1950_v43, %v1954_v52 }
 0x196   : > { %2229 = vrot.lane.b32.xlu1 %v2186_v16, %s3467_s30  ;;  %2436 = vrot.lane.b32.xlu0 %v2189_v6, %s3474_s18 }
 0x19a   : > { %2306 = vrot.lane.b32.xlu1 %v1967_v19, %s3472_s16  ;;  %2231 = vrot.lane.b32.xlu0 %v2189_v6, %s3467_s30 }
 0x19c   : > { %v3319_v35 = vpop.f32.mrb[4].mxu0 }
 0x19d   : > { %v1655_v34 = vmul.f32 %v3319_v35, %v4084_v0  ;;  %v1531_v23 = vpop.f32.mrb[5].mxu0 }
 0x19e   : > { %v1653_v27 = vmul.f32 %v4084_v0, %v1531_v23  ;;  %2126 = vrot.lane.b32.xlu1 %v1967_v19, %s3468_s8  ;;  %v3320_v37 = vpop.f32.mrb[6].mxu0  ;;  %2340 = vrot.lane.b32.xlu0 %v2186_v16, %s3471_s15 }
 0x19f   : > { %v1694_v26 = vadd.f32 %v4089_v14, %v1655_v34  ;;  %v1656_v58 = vmul.f32 %v3320_v37, %v4084_v0  ;;  %v1534_v36 = vpop.f32.mrb[7].mxu0 }
 0x1a0   : > { %v1692_v29 = vadd.f32 %v4089_v14, %v1653_v27  ;;  %v1654_v44 = vmul.f32 %v4084_v0, %v1534_v36 }
 0x1a1   : > { %v1695_v45 = vadd.f32 %v4089_v14, %v1656_v58  ;;  %v1726_v42 = vmax.f32 %v1694_v26, 0.0 }
 0x1a2   : > { %v1693_v48 = vadd.f32 %v4089_v14, %v1654_v44  ;;  %2404 = vrot.lane.b32.xlu0 %v1967_v19, %s3473_s17  ;;  %v1724_v54 = vmax.f32 %v1692_v29, 0.0 }
 0x1a3   : > { %v1727_v49 = vmax.f32 %v1695_v45, 0.0 }
 0x1a4   : > { %v1725_v30 = vmax.f32 %v1693_v48, 0.0 }
 0x1a5   : > { %v1755_v55 = vpack.c.bf16 %v1727_v49, %v1726_v42 }
 0x1a6   : > { %v1754_v46 = vpack.c.bf16 %v1725_v30, %v1724_v54  ;;  %2124 = vrot.lane.b32.xlu0 %v1955_v53, %s3468_s8 }
 0x1a7   : > { %v1790_v51 = vshrl.u32 %v1755_v55, 16  ;;  %v1793_v50 = vshll.u32 %v1755_v55, 16 }
 0x1a8   : > { %v1783_v41 = vshrl.u32 %v1754_v46, 16  ;;  %v1786_v59 = vshll.u32 %v1754_v46, 16 }
 0x1a9   : > { %v1792_v57 = vrot.slane %v1790_v51, 7 }
 0x1aa   : > { %v1785_v56 = vrot.slane %v1783_v41, 7  ;;  %2304 = vrot.lane.b32.xlu0 %v1955_v53, %s3472_s16 }
 0x1ab   : > { %v1795_v38 = vor.u32 %v1793_v50, %v1792_v57  ;;  %v1921_v1 = vsel %vm3524_vm2, %v1792_v57, 0 }
 0x1ac   : > { %v1788_v60 = vor.u32 %v1786_v59, %v1785_v56  ;;  %v2194_v31 = vrot.slane %v1921_v1, 1  ;;  %v1920_v12 = vsel %vm3524_vm2, %v1785_v56, 0  ;;  %v1988_v21 = vshll.u32 %v1921_v1, 16 }
 0x1ad   : > { %v4168_v63 = vsel %vm3524_vm2, 0, %v1795_v38  ;;  %v2191_v22 = vrot.slane %v1920_v12, 1  ;;  %v1976_v39 = vshll.u32 %v1920_v12, 16 }
 0x1ae   : > { %2266 = vrot.lane.b32.xlu1 %v4168_v63, %s3469_s9  ;;  %2376 = vrot.lane.b32.xlu0 %v4168_v63, %s3470_s12  ;;  %v4178_v4 = vsel %vm3524_vm2, 0, %v1788_v60  ;;  %v2193_v9 = vrot.slane %v4168_v63, 1  ;;  %v1983_v62 = vshll.u32 %v4168_v63, 16  ;;  %v1981_v24 = vshrl.u32 %v4168_v63, 16 }
 0x1af   : > { %v2190_v15 = vrot.slane %v4178_v4, 1  ;;  %v1971_v28 = vshll.u32 %v4178_v4, 16  ;;  %v1990_v33 = vrot.slane %v1988_v21, 1  ;;  %v1969_v36 = vshrl.u32 %v4178_v4, 16 }
 0x1b0   : > { %v2195_v61 = vsel %vm853_vm3, %v2193_v9, %v2194_v31  ;;  %v1985_v6 = vrot.slane %v1983_v62, 1  ;;  %v1978_v49 = vrot.slane %v1976_v39, 1 }
 0x1b1   : > { %v2192_v20 = vsel %vm853_vm3, %v2190_v15, %v2191_v22  ;;  %v1973_v23 = vrot.slane %v1971_v28, 1 }
 0x1b2   : > { %2374 = vrot.lane.b32.xlu1 %v4178_v4, %s3470_s12  ;;  %2264 = vrot.lane.b32.xlu0 %v4178_v4, %s3469_s9  ;;  %v1986_v16 = vor.u32 %v1985_v6, %v1981_v24 }
 0x1b3   : > { %v1974_v45 = vor.u32 %v1973_v23, %v1969_v36 }
 0x1b4   : > { %v1991_v34 = vsel %vm596_vm4, %v1986_v16, %v1990_v33 }
 0x1b5   : > { %v1979_v55 = vsel %vm596_vm4, %v1974_v45, %v1978_v49 }
 0x1b6   : > { %2346 = vrot.lane.b32.xlu1 %v2195_v61, %s3471_s15  ;;  %2440 = vrot.lane.b32.xlu0 %v2195_v61, %s3474_s18 }
 0x1ba   : > { %2233 = vrot.lane.b32.xlu1 %v2192_v20, %s3467_s30  ;;  %2235 = vrot.lane.b32.xlu0 %v2195_v61, %s3467_s30 }
 0x1bc   : > { %v3323_v19 = vpop.f32.mrb[8].mxu0 }
 0x1bd   : > { %v1659_v47 = vmul.f32 %v3323_v19, %v4084_v0  ;;  %v1547_v35 = vpop.f32.mrb[9].mxu0 }
 0x1be   : > { %v1657_v13 = vmul.f32 %v4084_v0, %v1547_v35  ;;  %2310 = vrot.lane.b32.xlu1 %v1991_v34, %s3472_s16  ;;  %v3324_v27 = vpop.f32.mrb[10].mxu0  ;;  %2438 = vrot.lane.b32.xlu0 %v2192_v20, %s3474_s18 }
 0x1bf   : > { %v1698_v37 = vadd.f32 %v4089_v14, %v1659_v47  ;;  %v1660_v26 = vmul.f32 %v3324_v27, %v4084_v0  ;;  %v1550_v58 = vpop.f32.mrb[11].mxu0 }
 0x1c0   : > { %v1696_v32 = vadd.f32 %v4089_v14, %v1657_v13  ;;  %v1658_v29 = vmul.f32 %v4084_v0, %v1550_v58 }
 0x1c1   : > { %v1699_v44 = vadd.f32 %v4089_v14, %v1660_v26  ;;  %v1730_v48 = vmax.f32 %v1698_v37, 0.0 }
 0x1c2   : > { %v1697_v43 = vadd.f32 %v4089_v14, %v1658_v29  ;;  %2130 = vrot.lane.b32.xlu1 %v1991_v34, %s3468_s8  ;;  %2344 = vrot.lane.b32.xlu0 %v2192_v20, %s3471_s15  ;;  %v1728_v52 = vmax.f32 %v1696_v32, 0.0 }
 0x1c3   : > { %v1731_v42 = vmax.f32 %v1699_v44, 0.0 }
 0x1c4   : > { %v1729_v54 = vmax.f32 %v1697_v43, 0.0 }
 0x1c5   : > { %v1757_v30 = vpack.c.bf16 %v1731_v42, %v1730_v48 }
 0x1c6   : > { %v1756_v53 = vpack.c.bf16 %v1729_v54, %v1728_v52  ;;  %2406 = vrot.lane.b32.xlu1 %v1979_v55, %s3473_s17  ;;  %2408 = vrot.lane.b32.xlu0 %v1991_v34, %s3473_s17 }
 0x1c7   : > { %v1804_v46 = vshrl.u32 %v1757_v30, 16  ;;  %v1807_v57 = vshll.u32 %v1757_v30, 16 }
 0x1c8   : > { %v1797_v51 = vshrl.u32 %v1756_v53, 16  ;;  %v1800_v38 = vshll.u32 %v1756_v53, 16 }
 0x1c9   : > { %v1806_v41 = vrot.slane %v1804_v46, 7 }
 0x1ca   : > { %v1799_v50 = vrot.slane %v1797_v51, 7  ;;  %2128 = vrot.lane.b32.xlu1 %v1979_v55, %s3468_s8  ;;  %2308 = vrot.lane.b32.xlu0 %v1979_v55, %s3472_s16 }
 0x1cb   : > { %v1809_v56 = vor.u32 %v1807_v57, %v1806_v41  ;;  %v1923_v60 = vsel %vm3524_vm2, %v1806_v41, 0 }
 0x1cc   : > { %v1802_v59 = vor.u32 %v1800_v38, %v1799_v50  ;;  %v2200_v11 = vrot.slane %v1923_v60, 1  ;;  %v1922_v31 = vsel %vm3524_vm2, %v1799_v50, 0  ;;  %v2012_v22 = vshll.u32 %v1923_v60, 16 }
 0x1cd   : > { %v4226_v5 = vsel %vm3524_vm2, 0, %v1809_v56  ;;  %v2197_v6 = vrot.slane %v1922_v31, 1  ;;  %v2000_v26 = vshll.u32 %v1922_v31, 16 }
 0x1ce   : > { %2270 = vrot.lane.b32.xlu1 %v4226_v5, %s3469_s9  ;;  %2380 = vrot.lane.b32.xlu0 %v4226_v5, %s3470_s12  ;;  %v4236_v1 = vsel %vm3524_vm2, 0, %v1802_v59  ;;  %v2199_v9 = vrot.slane %v4226_v5, 1  ;;  %v2007_v62 = vshll.u32 %v4226_v5, 16  ;;  %v2005_v18 = vshrl.u32 %v4226_v5, 16 }
 0x1cf   : > { %v2196_v61 = vrot.slane %v4236_v1, 1  ;;  %v1995_v25 = vshll.u32 %v4236_v1, 16  ;;  %v2014_v20 = vrot.slane %v2012_v22, 1  ;;  %v1993_v37 = vshrl.u32 %v4236_v1, 16 }
 0x1d0   : > { %v2201_v12 = vsel %vm853_vm3, %v2199_v9, %v2200_v11  ;;  %v2009_v15 = vrot.slane %v2007_v62, 1  ;;  %v2002_v43 = vrot.slane %v2000_v26, 1 }
 0x1d1   : > { %v2198_v24 = vsel %vm853_vm3, %v2196_v61, %v2197_v6  ;;  %v1997_v47 = vrot.slane %v1995_v25, 1 }
 0x1d2   : > { %2378 = vrot.lane.b32.xlu1 %v4236_v1, %s3470_s12  ;;  %2268 = vrot.lane.b32.xlu0 %v4236_v1, %s3469_s9  ;;  %v2010_v21 = vor.u32 %v2009_v15, %v2005_v18 }
 0x1d3   : > { %v1998_v32 = vor.u32 %v1997_v47, %v1993_v37 }
 0x1d4   : > { %v2015_v19 = vsel %vm596_vm4, %v2010_v21, %v2014_v20 }
 0x1d5   : > { %v2003_v52 = vsel %vm596_vm4, %v1998_v32, %v2002_v43 }
 0x1d6   : > { %2350 = vrot.lane.b32.xlu1 %v2201_v12, %s3471_s15  ;;  %2444 = vrot.lane.b32.xlu0 %v2201_v12, %s3474_s18 }
 0x1da   : > { %2237 = vrot.lane.b32.xlu1 %v2198_v24, %s3467_s30  ;;  %2239 = vrot.lane.b32.xlu0 %v2201_v12, %s3467_s30 }
 0x1dc   : > { %v3327_v16 = vpop.f32.mrb[12].mxu0 }
 0x1dd   : > { %v1663_v28 = vmul.f32 %v3327_v16, %v4084_v0  ;;  %v1563_v33 = vpop.f32.mrb[13].mxu0 }
 0x1de   : > { %v1661_v35 = vmul.f32 %v4084_v0, %v1563_v33  ;;  %2314 = vrot.lane.b32.xlu1 %v2015_v19, %s3472_s16  ;;  %v3328_v34 = vpop.f32.mrb[14].mxu0  ;;  %2442 = vrot.lane.b32.xlu0 %v2198_v24, %s3474_s18 }
 0x1df   : > { %v1702_v23 = vadd.f32 %v4089_v14, %v1663_v28  ;;  %v1664_v13 = vmul.f32 %v3328_v34, %v4084_v0  ;;  %v1566_v27 = vpop.f32.mrb[15].mxu0 }
 0x1e0   : > { %v1700_v58 = vadd.f32 %v4089_v14, %v1661_v35  ;;  %v1662_v36 = vmul.f32 %v4084_v0, %v1566_v27 }
 0x1e1   : > { %v1703_v39 = vadd.f32 %v4089_v14, %v1664_v13  ;;  %v1734_v44 = vmax.f32 %v1702_v23, 0.0 }
 0x1e2   : > { %v1701_v29 = vadd.f32 %v4089_v14, %v1662_v36  ;;  %2134 = vrot.lane.b32.xlu1 %v2015_v19, %s3468_s8  ;;  %2348 = vrot.lane.b32.xlu0 %v2198_v24, %s3471_s15  ;;  %v1732_v48 = vmax.f32 %v1700_v58, 0.0 }
 0x1e3   : > { %v1735_v45 = vmax.f32 %v1703_v39, 0.0 }
 0x1e4   : > { %v1733_v42 = vmax.f32 %v1701_v29, 0.0 }
 0x1e5   : > { %v1759_v49 = vpack.c.bf16 %v1735_v45, %v1734_v44 }
 0x1e6   : > { %v1758_v54 = vpack.c.bf16 %v1733_v42, %v1732_v48  ;;  %2410 = vrot.lane.b32.xlu1 %v2003_v52, %s3473_s17  ;;  %2412 = vrot.lane.b32.xlu0 %v2015_v19, %s3473_s17 }
 0x1e7   : > { %v1818_v30 = vshrl.u32 %v1759_v49, 16  ;;  %v1821_v46 = vshll.u32 %v1759_v49, 16 }
 0x1e8   : > { %v1811_v55 = vshrl.u32 %v1758_v54, 16  ;;  %v1814_v57 = vshll.u32 %v1758_v54, 16 }
 0x1e9   : > { %v1820_v53 = vrot.slane %v1818_v30, 7 }
 0x1ea   : > { %v1813_v51 = vrot.slane %v1811_v55, 7  ;;  %2132 = vrot.lane.b32.xlu1 %v2003_v52, %s3468_s8  ;;  %2312 = vrot.lane.b32.xlu0 %v2003_v52, %s3472_s16 }
 0x1eb   : > { %v1823_v41 = vor.u32 %v1821_v46, %v1820_v53  ;;  %v1925_v38 = vsel %vm3524_vm2, %v1820_v53, 0 }
 0x1ec   : > { %v1816_v50 = vor.u32 %v1814_v57, %v1813_v51  ;;  %v2206_v62 = vrot.slane %v1925_v38, 1  ;;  %v1924_v11 = vsel %vm3524_vm2, %v1813_v51, 0  ;;  %v2036_v18 = vshll.u32 %v1925_v38, 16 }
 0x1ed   : > { %v4276_v56 = vsel %vm3524_vm2, 0, %v1823_v41  ;;  %v2203_v15 = vrot.slane %v1924_v11, 1  ;;  %v2024_v58 = vshll.u32 %v1924_v11, 16 }
 0x1ee   : > { %2274 = vrot.lane.b32.xlu1 %v4276_v56, %s3469_s9  ;;  %2384 = vrot.lane.b32.xlu0 %v4276_v56, %s3470_s12  ;;  %v4286_v59 = vsel %vm3524_vm2, 0, %v1816_v50  ;;  %v2205_v60 = vrot.slane %v4276_v56, 1  ;;  %v2031_v9 = vshll.u32 %v4276_v56, 16  ;;  %v2029_v6 = vshrl.u32 %v4276_v56, 16 }
 0x1ef   : > { %v2202_v12 = vrot.slane %v4286_v59, 1  ;;  %v2019_v21 = vshll.u32 %v4286_v59, 16  ;;  %v2038_v20 = vrot.slane %v2036_v18, 1  ;;  %v2017_v26 = vshrl.u32 %v4286_v59, 16 }
 0x1f0   : > { %v2207_v31 = vsel %vm853_vm3, %v2205_v60, %v2206_v62  ;;  %v2033_v61 = vrot.slane %v2031_v9, 1  ;;  %v2026_v49 = vrot.slane %v2024_v58, 1 }
 0x1f1   : > { %v2204_v22 = vsel %vm853_vm3, %v2202_v12, %v2203_v15  ;;  %v2021_v35 = vrot.slane %v2019_v21, 1 }
 0x1f2   : > { %2382 = vrot.lane.b32.xlu1 %v4286_v59, %s3470_s12  ;;  %2272 = vrot.lane.b32.xlu0 %v4286_v59, %s3469_s9  ;;  %v2034_v24 = vor.u32 %v2033_v61, %v2029_v6 }
 0x1f3   : > { %v2022_v29 = vor.u32 %v2021_v35, %v2017_v26 }
 0x1f4   : > { %v2039_v19 = vsel %vm596_vm4, %v2034_v24, %v2038_v20 }
 0x1f5   : > { %v2027_v55 = vsel %vm596_vm4, %v2022_v29, %v2026_v49 }
 0x1f6   : > { %2354 = vrot.lane.b32.xlu1 %v2207_v31, %s3471_s15  ;;  %2448 = vrot.lane.b32.xlu0 %v2207_v31, %s3474_s18 }
 0x1fa   : > { %2241 = vrot.lane.b32.xlu1 %v2204_v22, %s3467_s30  ;;  %2243 = vrot.lane.b32.xlu0 %v2207_v31, %s3467_s30 }
 0x1fb   : > { %v3331_v25 = vpop.f32.mrb[16].mxu0 }
 0x1fc   : > { %v1667_v16 = vmul.f32 %v3331_v25, %v4084_v0  ;;  %v1579_v28 = vpop.f32.mrb[17].mxu0 }
 0x1fd   : > { %v1665_v33 = vmul.f32 %v4084_v0, %v1579_v28  ;;  %v3332_v47 = vpop.f32.mrb[18].mxu0 }
 0x1fe   : > { %v1706_v34 = vadd.f32 %v4089_v14, %v1667_v16  ;;  %2318 = vrot.lane.b32.xlu1 %v2039_v19, %s3472_s16  ;;  %v1668_v23 = vmul.f32 %v3332_v47, %v4084_v0  ;;  %2446 = vrot.lane.b32.xlu0 %v2204_v22, %s3474_s18  ;;  %v1582_v13 = vpop.f32.mrb[19].mxu0 }
 0x1ff   : > { %v1704_v27 = vadd.f32 %v4089_v14, %v1665_v33  ;;  %v1666_v37 = vmul.f32 %v4084_v0, %v1582_v13 }
 0x200   : > { %v1707_v36 = vadd.f32 %v4089_v14, %v1668_v23  ;;  %v4316_v39 = vpop.permute.xlu0 %2372  ;;  %v1738_v44 = vmax.f32 %v1706_v34, 0.0  ;;  %v4321_v42 = vpop.permute.xlu1 %2262 }
 0x201   : > { %v1705_v32 = vadd.f32 %v4089_v14, %v1666_v37  ;;  %v1736_v43 = vmax.f32 %v1704_v27, 0.0 }
 0x202   : > { %v1739_v45 = vmax.f32 %v1707_v36, 0.0  ;;  %2138 = vrot.lane.b32.xlu1 %v2039_v19, %s3468_s8  ;;  %2352 = vrot.lane.b32.xlu0 %v2204_v22, %s3471_s15 }
 0x203   : > { %v1737_v48 = vmax.f32 %v1705_v32, 0.0 }
 0x204   : > { %v1761_v52 = vpack.c.bf16 %v1739_v45, %v1738_v44  ;;  %v2261_v54 = vpop.permute.xlu0 %2260  ;;  %v4328_v38 = vpop.permute.xlu1 %2342 }
 0x205   : > { %v1760_v30 = vpack.c.bf16 %v1737_v48, %v1736_v43  ;;  %v2529_v36 = vsel %vm1226_vm8, %v3782_v40, %v2261_v54 }
 0x206   : > { %v1832_v53 = vshrl.u32 %v1761_v52, 16  ;;  %2414 = vrot.lane.b32.xlu1 %v2027_v55, %s3473_s17  ;;  %2416 = vrot.lane.b32.xlu0 %v2039_v19, %s3473_s17  ;;  %v1835_v41 = vshll.u32 %v1761_v52, 16 }
 0x207   : > { %v1825_v46 = vshrl.u32 %v1760_v30, 16  ;;  %v1828_v9 = vshll.u32 %v1760_v30, 16 }
 0x208   : > { %v1834_v51 = vrot.slane %v1832_v53, 7  ;;  %v4326_v57 = vpop.permute.xlu0 %2436  ;;  %v4342_v12 = vpop.permute.xlu1 %2229 }
 0x209   : > { %v1827_v50 = vrot.slane %v1825_v46, 7 }
 0x20a   : > { %v1837_v60 = vor.u32 %v1835_v41, %v1834_v51  ;;  %2136 = vrot.lane.b32.xlu1 %v2027_v55, %s3468_s8  ;;  %2316 = vrot.lane.b32.xlu0 %v2027_v55, %s3472_s16  ;;  %v1927_v15 = vsel %vm3524_vm2, %v1834_v51, 0 }
 0x20b   : > { %v1830_v31 = vor.u32 %v1828_v9, %v1827_v50  ;;  %v2212_v24 = vrot.slane %v1927_v15, 1  ;;  %v1926_v25 = vsel %vm3524_vm2, %v1827_v50, 0  ;;  %v2060_v35 = vshll.u32 %v1927_v15, 16 }
 0x20c   : > { %v4332_v62 = vpop.permute.xlu0 %2231  ;;  %v4336_v11 = vsel %vm3524_vm2, 0, %v1837_v60  ;;  %v4358_v20 = vpop.permute.xlu1 %2306  ;;  %v2209_v19 = vrot.slane %v1926_v25, 1  ;;  %v2048_v53 = vshll.u32 %v1926_v25, 16 }
 0x20d   : > { %v4348_v6 = vsel %vm3524_vm2, 0, %v1830_v31  ;;  %v2211_v18 = vrot.slane %v4336_v11, 1  ;;  %v2055_v22 = vshll.u32 %v4336_v11, 16  ;;  %v2053_v47 = vshrl.u32 %v4336_v11, 16 }
 0x20e   : > { %2278 = vrot.lane.b32.xlu1 %v4336_v11, %s3469_s9  ;;  %2388 = vrot.lane.b32.xlu0 %v4336_v11, %s3470_s12  ;;  %v2208_v28 = vrot.slane %v4348_v6, 1  ;;  %v2043_v27 = vshll.u32 %v4348_v6, 16  ;;  %v2062_v58 = vrot.slane %v2060_v35, 1  ;;  %v2041_v50 = vshrl.u32 %v4348_v6, 16 }
 0x20f   : > { %v2213_v16 = vsel %vm853_vm3, %v2211_v18, %v2212_v24  ;;  %v2057_v33 = vrot.slane %v2055_v22, 1 }
 0x210   : > { %v2341_v61 = vpop.permute.xlu0 %2340  ;;  %v2210_v23 = vsel %vm853_vm3, %v2208_v28, %v2209_v19  ;;  %v4369_v37 = vpop.permute.xlu1 %2126  ;;  %v2045_v52 = vrot.slane %v2043_v27, 1  ;;  %v2050_v28 = vrot.slane %v2048_v53, 1 }
 0x211   : > { %v2058_v13 = vor.u32 %v2057_v33, %v2053_v47 }
 0x212   : > { %2386 = vrot.lane.b32.xlu1 %v4348_v6, %s3470_s12  ;;  %2276 = vrot.lane.b32.xlu0 %v4348_v6, %s3469_s9  ;;  %v2046_v22 = vor.u32 %v2045_v52, %v2041_v50 }
 0x213   : > { %v2063_v48 = vsel %vm596_vm4, %v2058_v13, %v2062_v58 }
 0x214   : > { %v2405_v21 = vpop.permute.xlu0 %2404  ;;  %v2051_v35 = vsel %vm596_vm4, %v2046_v22, %v2050_v28 }
 0x216   : > { %2358 = vrot.lane.b32.xlu1 %v2213_v16, %s3471_s15  ;;  %2452 = vrot.lane.b32.xlu0 %v2213_v16, %s3474_s18 }
 0x218   : > { %v2125_v34 = vpop.permute.xlu0 %2124 }
 0x21a   : > { %2245 = vrot.lane.b32.xlu1 %v2210_v23, %s3467_s30  ;;  %2247 = vrot.lane.b32.xlu0 %v2213_v16, %s3467_s30 }
 0x21b   : > { %v3335_v26 = vpop.f32.mrb[20].mxu0 }
 0x21c   : > { %v1671_v32 = vmul.f32 %v3335_v26, %v4084_v0  ;;  %v2305_v29 = vpop.permute.xlu0 %2304  ;;  %v1595_v44 = vpop.f32.mrb[21].mxu0 }
 0x21d   : > { %v2561_v45 = vsel %vm1259_vm9, %v2529_v36, %v2305_v29  ;;  %v1669_v43 = vmul.f32 %v4084_v0, %v1595_v44  ;;  %v3336_v49 = vpop.f32.mrb[22].mxu0 }
 0x21e   : > { %v1710_v30 = vadd.f32 %v4089_v14, %v1671_v32  ;;  %v2593_v55 = vsel %vm1292_vm10, %v2561_v45, %v2341_v61  ;;  %2322 = vrot.lane.b32.xlu1 %v2063_v48, %s3472_s16  ;;  %v1672_v40 = vmul.f32 %v3336_v49, %v4084_v0  ;;  %2450 = vrot.lane.b32.xlu0 %v2210_v23, %s3474_s18  ;;  %v1598_v54 = vpop.f32.mrb[23].mxu0 }
 0x21f   : > { %v1708_v46 = vadd.f32 %v4089_v14, %v1669_v43  ;;  %v1670_v51 = vmul.f32 %v4084_v0, %v1598_v54  ;;  %v2625_v41 = vsel %vm1325_vm11, %v2593_v55, %v4316_v39  ;;  %v2469_v32 = vsel %vm1160_vm6, %v4130_v7, %v2125_v34 }
 0x220   : > { %v1711_v60 = vadd.f32 %v4089_v14, %v1672_v40  ;;  %v4388_v9 = vpop.permute.xlu1 %2266  ;;  %v4390_v31 = vpop.permute.xlu0 %2376  ;;  %v2657_v61 = vsel %vm1358_vm12, %v2625_v41, %v2405_v21  ;;  %v1742_v24 = vmax.f32 %v1710_v30, 0.0  ;;  %v2499_v30 = vsel %vm1193_vm7, %v2469_v32, %v4342_v12 }
 0x221   : > { %v1709_v15 = vadd.f32 %v4089_v14, %v1670_v51  ;;  %v2689_v18 = vsel %vm1391_vm13, %v2657_v61, %v4326_v57  ;;  %v1740_v39 = vmax.f32 %v1708_v46, 0.0  ;;  %v2531_v51 = vsel %vm1226_vm8, %v2499_v30, %v4321_v42 }
 0x222   : > { %v1743_v25 = vmax.f32 %v1711_v60, 0.0  ;;  %2142 = vrot.lane.b32.xlu1 %v2063_v48, %s3468_s8  ;;  %2356 = vrot.lane.b32.xlu0 %v2210_v23, %s3471_s15  ;;  %v2563_v60 = vsel %vm1259_vm9, %v2531_v51, %v4358_v20 }
 0x223   : > { %v1741_v16 = vmax.f32 %v1709_v15, 0.0  ;;  %3351 = vmatprep.mubr.msk.bf16.mxu1 %vm1444_vm14, %v2689_v18 }
 0x224   : > { %v1763_v33 = vpack.c.bf16 %v1743_v25, %v1742_v24  ;;  %v2375_v19 = vpop.permute.xlu1 %2374  ;;  %v4399_v21 = vpop.permute.xlu0 %2264  ;;  %v2595_v24 = vsel %vm1292_vm10, %v2563_v60, %v4328_v38  ;;  %v2471_v25 = vsel %vm1160_vm6, %v4121_v8, %v4369_v37 }
 0x225   : > { %v1762_v47 = vpack.c.bf16 %v1741_v16, %v1740_v39  ;;  %v2627_v20 = vsel %vm1325_vm11, %v2595_v24, %v2375_v19  ;;  %v2501_v8 = vsel %vm1193_vm7, %v2471_v25, %v4332_v62 }
 0x226   : > { %v1846_v57 = vshrl.u32 %v1763_v33, 16  ;;  %2418 = vrot.lane.b32.xlu1 %v2051_v35, %s3473_s17  ;;  %2420 = vrot.lane.b32.xlu0 %v2063_v48, %s3473_s17  ;;  %v1849_v29 = vshll.u32 %v1763_v33, 16 }
 0x227   : > { %v1839_v13 = vshrl.u32 %v1762_v47, 16  ;;  %v1842_v36 = vshll.u32 %v1762_v47, 16 }
 0x228   : > { %v4404_v27 = vpop.permute.xlu1 %2346  ;;  %v4406_v23 = vpop.permute.xlu0 %2440  ;;  %v1848_v26 = vrot.slane %v1846_v57, 7 }
 0x229   : > { %v1841_v58 = vrot.slane %v1839_v13, 7  ;;  %v2533_v13 = vsel %vm1226_vm8, %v2501_v8, %v4399_v21 }
 0x22a   : > { %2140 = vrot.lane.b32.xlu1 %v2051_v35, %s3468_s8  ;;  %2320 = vrot.lane.b32.xlu0 %v2051_v35, %s3472_s16  ;;  %v1851_v49 = vor.u32 %v1849_v29, %v1848_v26  ;;  %v1929_v33 = vsel %vm3524_vm2, %v1848_v26, 0 }
 0x22b   : > { %v1844_v44 = vor.u32 %v1842_v36, %v1841_v58  ;;  %v1928_v45 = vsel %vm3524_vm2, %v1841_v58, 0  ;;  %v2084_v57 = vshll.u32 %v1929_v33, 16 }
 0x22c   : > { %v4414_v43 = vpop.permute.xlu1 %2233  ;;  %v4416_v48 = vpop.permute.xlu0 %2235  ;;  %v2215_v34 = vrot.slane %v1928_v45, 1  ;;  %v4436_v12 = vsel %vm3524_vm2, 0, %v1851_v49  ;;  %v2072_v50 = vshll.u32 %v1928_v45, 16 }
 0x22d   : > { %v4420_v52 = vsel %vm3524_vm2, 0, %v1844_v44  ;;  %v2079_v42 = vshll.u32 %v4436_v12, 16  ;;  %v2077_v19 = vshrl.u32 %v4436_v12, 16 }
 0x22e   : > { %2390 = vrot.lane.b32.xlu1 %v4420_v52, %s3470_s12  ;;  %v2214_v7 = vrot.slane %v4420_v52, 1  ;;  %v2067_v55 = vshll.u32 %v4420_v52, 16  ;;  %v2065_v41 = vshrl.u32 %v4420_v52, 16  ;;  %v2074_v22 = vrot.slane %v2072_v50, 1 }
 0x22f   : > { %v2081_v35 = vrot.slane %v2079_v42, 1 }
 0x230   : > { %v4428_v40 = vpop.permute.xlu1 %2310  ;;  %v2439_v54 = vpop.permute.xlu0 %2438  ;;  %v2216_v53 = vsel %vm853_vm3, %v2214_v7, %v2215_v34  ;;  %v2069_v46 = vrot.slane %v2067_v55, 1  ;;  %v2086_v55 = vrot.slane %v2084_v57, 1 }
 0x231   : > { %2454 = vrot.lane.b32.xlu0 %v2216_v53, %s3474_s18  ;;  %v2082_v44 = vor.u32 %v2081_v35, %v2077_v19 }
 0x232   : > { %2282 = vrot.lane.b32.xlu1 %v4436_v12, %s3469_s9  ;;  %v2070_v18 = vor.u32 %v2069_v46, %v2065_v41 }
 0x233   : > { %v4491_v60 = vsel %vm596_vm4, %v2082_v44, %v2086_v55 }
 0x234   : > { %v4443_v61 = vpop.permute.xlu1 %2130  ;;  %v2345_v15 = vpop.permute.xlu0 %2344  ;;  %v2075_v28 = vsel %vm596_vm4, %v2070_v18, %v2074_v22  ;;  %v2218_v22 = vrot.slane %v1929_v33, 1 }
 0x235   : > { %2280 = vrot.lane.b32.xlu0 %v4420_v52, %s3469_s9 }
 0x236   : > { %2249 = vrot.lane.b32.xlu1 %v2216_v53, %s3467_s30 }
 0x238   : > { %v2407_v39 = vpop.permute.xlu1 %2406  ;;  %v2409_v16 = vpop.permute.xlu0 %2408 }
 0x239   : > { %v2659_v47 = vsel %vm1358_vm12, %v2627_v20, %v2407_v39  ;;  %2324 = vrot.lane.b32.xlu0 %v2075_v28, %s3472_s16 }
 0x23a   : > { %2422 = vrot.lane.b32.xlu1 %v2075_v28, %s3473_s17  ;;  %v2691_v38 = vsel %vm1391_vm13, %v2659_v47, %v2439_v54 }
 0x23b   : > { %3352 = vmatmul.mubr.msk.bf16.vlgmr.msra.gmra.mrb[0].mxu1 %vm1444_vm14, %v2691_v38  ;;  %v3339_v37 = vpop.f32.mrb[24].mxu0 }
 0x23c   : > { %v2129_v26 = vpop.permute.xlu1 %2128  ;;  %v1675_v58 = vmul.f32 %v3339_v37, %v4084_v0  ;;  %v2309_v36 = vpop.permute.xlu0 %2308 }
 0x23d   : > { %v2565_v32 = vsel %vm1259_vm9, %v2533_v13, %v2309_v36  ;;  %v1611_v29 = vpop.f32.mrb[25].mxu0  ;;  %2360 = vrot.lane.b32.xlu0 %v2216_v53, %s3471_s15  ;;  %v2473_v8 = vsel %vm1160_vm6, %v4178_v4, %v2129_v26 }
 0x23e   : > { %v2597_v62 = vsel %vm1292_vm10, %v2565_v32, %v2345_v15  ;;  %v1673_v45 = vmul.f32 %v4084_v0, %v1611_v29  ;;  %v3340_v49 = vpop.f32.mrb[26].mxu0  ;;  %2144 = vrot.lane.b32.xlu1 %v2075_v28, %s3468_s8  ;;  %v1714_v30 = vadd.f32 %v4089_v14, %v1675_v58  ;;  %v2217_v15 = vrot.slane %v4436_v12, 1 }
 0x23f   : > { %v2629_v21 = vsel %vm1325_vm11, %v2597_v62, %v4390_v31  ;;  %v1676_v7 = vmul.f32 %v3340_v49, %v4084_v0  ;;  %v1614_v34 = vpop.f32.mrb[27].mxu0  ;;  %v2503_v58 = vsel %vm1193_vm7, %v2473_v8, %v4414_v43 }
 0x240   : > { %v1712_v54 = vadd.f32 %v4089_v14, %v1673_v45  ;;  %v1674_v53 = vmul.f32 %v4084_v0, %v1614_v34  ;;  %v4480_v46 = vpop.permute.xlu1 %2270  ;;  %v4482_v51 = vpop.permute.xlu0 %2380  ;;  %v2661_v41 = vsel %vm1358_vm12, %v2629_v21, %v2409_v16  ;;  %v1746_v18 = vmax.f32 %v1714_v30, 0.0 }
 0x241   : > { %v1715_v50 = vadd.f32 %v4089_v14, %v1676_v7  ;;  %2392 = vrot.lane.b32.xlu0 %v4436_v12, %s3470_s12  ;;  %v2693_v31 = vsel %vm1391_vm13, %v2661_v41, %v4406_v23  ;;  %v2219_v16 = vsel %vm853_vm3, %v2217_v15, %v2218_v22  ;;  %v2535_v43 = vsel %vm1226_vm8, %v2503_v58, %v4388_v9 }
 0x242   : > { %v1713_v0 = vadd.f32 %v4089_v14, %v1674_v53  ;;  %3355 = vmatprep.mubr.msk.bf16.mxu1 %vm1444_vm14, %v2693_v31  ;;  %2326 = vrot.lane.b32.xlu1 %v4491_v60, %s3472_s16  ;;  %v1744_v24 = vmax.f32 %v1712_v54, 0.0  ;;  %v2567_v53 = vsel %vm1259_vm9, %v2535_v43, %v4428_v40  ;;  %v2475_v40 = vsel %vm1160_vm6, %v4168_v63, %v4443_v61 }
 0x243   : > { %v1747_v42 = vmax.f32 %v1715_v50, 0.0  ;;  %v2599_v15 = vsel %vm1292_vm10, %v2567_v53, %v4404_v27 }
 0x244   : > { %v1745_v25 = vmax.f32 %v1713_v0, 0.0  ;;  %v2379_v20 = vpop.permute.xlu1 %2378  ;;  %v4498_v39 = vpop.permute.xlu0 %2268 }
 0x245   : > { %v1765_v23 = vpack.c.bf16 %v1747_v42, %v1746_v18  ;;  %2424 = vrot.lane.b32.xlu0 %v4491_v60, %s3473_s17  ;;  %v2631_v0 = vsel %vm1325_vm11, %v2599_v15, %v2379_v20 }
 0x246   : > { %v1764_v14 = vpack.c.bf16 %v1745_v25, %v1744_v24  ;;  %2362 = vrot.lane.b32.xlu1 %v2219_v16, %s3471_s15  ;;  %v3440_v25 = vld [vmem:[%s4941_s2] ss:$0 sm:$0xff] }
 0x247   : > { %v1860_v36 = vshrl.u32 %v1765_v23, 16  ;;  %v1863_v54 = vshll.u32 %v1765_v23, 16 }
 0x248   : > { %v1853_v28 = vshrl.u32 %v1764_v14, 16  ;;  %v4504_v47 = vpop.permute.xlu1 %2350  ;;  %v4506_v35 = vpop.permute.xlu0 %2444  ;;  %v1856_v38 = vshll.u32 %v1764_v14, 16  ;;  %v2505_v14 = vsel %vm1193_vm7, %v2475_v40, %v4416_v48 }
 0x249   : > { %2456 = vrot.lane.b32.xlu0 %v2219_v16, %s3474_s18  ;;  %v1862_v7 = vrot.slane %v1860_v36, 7 }
 0x24a   : > { %v1855_v33 = vrot.slane %v1853_v28, 7 }
 0x24b   : > { %v1865_v9 = vor.u32 %v1863_v54, %v1862_v7 }
 0x24c   : > { %v1858_v37 = vor.u32 %v1856_v38, %v1855_v33  ;;  %v4511_v19 = vpop.permute.xlu1 %2237  ;;  %v4513_v57 = vpop.permute.xlu0 %2239  ;;  %v1930_v13 = vsel %vm3524_vm2, %v1855_v33, 0 }
 0x24d   : > { %v2221_v26 = vrot.slane %v1930_v13, 1  ;;  %v2096_v44 = vshll.u32 %v1930_v13, 16  ;;  %v4558_v63 = vsel %vm3524_vm2, 0, %v1865_v9 }
 0x24e   : > { %v4521_v32 = vsel %vm3524_vm2, 0, %v1858_v37  ;;  %v2537_v37 = vsel %vm1226_vm8, %v2505_v14, %v4498_v39 }
 0x24f   : > { %2394 = vrot.lane.b32.xlu1 %v4521_v32, %s3470_s12  ;;  %v2220_v4 = vrot.slane %v4521_v32, 1  ;;  %v2091_v29 = vshll.u32 %v4521_v32, 16  ;;  %v2089_v30 = vshrl.u32 %v4521_v32, 16  ;;  %v2098_v55 = vrot.slane %v2096_v44, 1 }
 0x250   : > { %v4527_v62 = vpop.permute.xlu1 %2314  ;;  %v2443_v45 = vpop.permute.xlu0 %2442 }
 0x251   : > { %v2222_v49 = vsel %vm853_vm3, %v2220_v4, %v2221_v26  ;;  %v2093_v21 = vrot.slane %v2091_v29, 1  ;;  %v2103_v4 = vshll.u32 %v4558_v63, 16 }
 0x252   : > { %2458 = vrot.lane.b32.xlu0 %v2222_v49, %s3474_s18 }
 0x253   : > { %v2094_v34 = vor.u32 %v2093_v21, %v2089_v30  ;;  %v1931_v21 = vsel %vm3524_vm2, %v1862_v7, 0  ;;  %v2101_v7 = vshrl.u32 %v4558_v63, 16 }
 0x254   : > { %v4536_v41 = vpop.permute.xlu1 %2134  ;;  %v2349_v50 = vpop.permute.xlu0 %2348  ;;  %v2108_v15 = vshll.u32 %v1931_v21, 16 }
 0x255   : > { %v2099_v31 = vsel %vm596_vm4, %v2094_v34, %v2098_v55 }
 0x256   : > { %2426 = vrot.lane.b32.xlu1 %v2099_v31, %s3473_s17  ;;  %2251 = vrot.lane.b32.xlu0 %v2219_v16, %s3467_s30 }
 0x258   : > { %v2411_v18 = vpop.permute.xlu1 %2410  ;;  %v2413_v42 = vpop.permute.xlu0 %2412 }
 0x259   : > { %v2663_v22 = vsel %vm1358_vm12, %v2631_v0, %v2411_v18  ;;  %v3343_v24 = vpop.f32.mrb[28].mxu0 }
 0x25a   : > { %v1679_v23 = vmul.f32 %v3440_v25, %v3343_v24  ;;  %2146 = vrot.lane.b32.xlu1 %v4491_v60, %s3468_s8  ;;  %v1627_v27 = vpop.f32.mrb[29].mxu0  ;;  %2284 = vrot.lane.b32.xlu0 %v4521_v32, %s3469_s9  ;;  %v2695_v20 = vsel %vm1391_vm13, %v2663_v22, %v2443_v45  ;;  %v3441_v60 = vld [vmem:[%s4942_s3] ss:$0 sm:$0xff]  ;;  %v2110_v24 = vrot.slane %v2108_v15, 1 }
 0x25b   : > { %v1677_v61 = vmul.f32 %v3440_v25, %v1627_v27  ;;  %v3344_v16 = vpop.f32.mrb[30].mxu0  ;;  %3356 = vmatmul.mubr.msk.bf16.gmra.mrb[4].mxu1 %vm1444_vm14, %v2695_v20  ;;  %v2223_v20 = vrot.slane %v4558_v63, 1 }
 0x25c   : > { %v1718_v28 = vadd.f32 %v3441_v60, %v1679_v23  ;;  %v1680_v33 = vmul.f32 %v3440_v25, %v3344_v16  ;;  %v2133_v38 = vpop.permute.xlu1 %2132  ;;  %v1630_v8 = vpop.f32.mrb[31].mxu0  ;;  %v2224_v16 = vrot.slane %v1931_v21, 1 }
 0x25d   : > { %v1716_v13 = vadd.f32 %v3441_v60, %v1677_v61  ;;  %v1678_v58 = vmul.f32 %v3440_v25, %v1630_v8  ;;  %v2313_v36 = vpop.permute.xlu0 %2312  ;;  %v2477_v61 = vsel %vm1160_vm6, %v4236_v1, %v2133_v38 }
 0x25e   : > { %v1719_v26 = vadd.f32 %v3441_v60, %v1680_v33  ;;  %v2569_v29 = vsel %vm1259_vm9, %v2537_v37, %v2313_v36  ;;  %2148 = vrot.lane.b32.xlu1 %v2099_v31, %s3468_s8  ;;  %2328 = vrot.lane.b32.xlu0 %v2099_v31, %s3472_s16  ;;  %v1750_v45 = vmax.f32 %v1718_v28, 0.0  ;;  %v2105_v31 = vrot.slane %v2103_v4, 1 }
 0x25f   : > { %v1717_v48 = vadd.f32 %v3441_v60, %v1678_v58  ;;  %v2601_v44 = vsel %vm1292_vm10, %v2569_v29, %v2349_v50  ;;  %v1748_v34 = vmax.f32 %v1716_v13, 0.0  ;;  %v2225_v37 = vsel %vm853_vm3, %v2223_v20, %v2224_v16 }
 0x260   : > { %v1751_v43 = vmax.f32 %v1719_v26, 0.0  ;;  %v2633_v39 = vsel %vm1325_vm11, %v2601_v44, %v4482_v51  ;;  %v4575_v30 = vpop.permute.xlu1 %2274  ;;  %v2106_v22 = vor.u32 %v2105_v31, %v2101_v7  ;;  %v2507_v1 = vsel %vm1193_vm7, %v2477_v61, %v4511_v19 }
 0x261   : > { %v1749_v55 = vmax.f32 %v1717_v48, 0.0  ;;  %v4579_v54 = vpop.permute.xlu0 %2384  ;;  %v2665_v53 = vsel %vm1358_vm12, %v2633_v39, %v2413_v42  ;;  %v2539_v48 = vsel %vm1226_vm8, %v2507_v1, %v4480_v46 }
 0x262   : > { %v1767_v9 = vpack.c.bf16 %v1751_v43, %v1750_v45  ;;  %2253 = vrot.lane.b32.xlu1 %v2222_v49, %s3467_s30  ;;  %2364 = vrot.lane.b32.xlu0 %v2222_v49, %s3471_s15  ;;  %v2697_v51 = vsel %vm1391_vm13, %v2665_v53, %v4506_v35  ;;  %v2111_v27 = vsel %vm596_vm4, %v2106_v22, %v2110_v24 }
 0x263   : > { %v1766_v50 = vpack.c.bf16 %v1749_v55, %v1748_v34  ;;  %3359 = vmatprep.mubr.msk.bf16.mxu1 %vm1444_vm14, %v2697_v51  ;;  %v2571_v34 = vsel %vm1259_vm9, %v2539_v48, %v4527_v62  ;;  %v2479_v62 = vsel %vm1160_vm6, %v4226_v5, %v4536_v41 }
 0x264   : > { %v2383_v0 = vpop.permute.xlu1 %2382  ;;  %v1934_v58 = vshrl.u32 %v1767_v9, 16  ;;  %v1937_v21 = vshll.u32 %v1767_v9, 16  ;;  %v2603_v51 = vsel %vm1292_vm10, %v2571_v34, %v4504_v47 }
 0x265   : > { %v1867_v18 = vshrl.u32 %v1766_v50, 16  ;;  %v2273_v40 = vpop.permute.xlu0 %2272  ;;  %v1870_v42 = vshll.u32 %v1766_v50, 16  ;;  %v2635_v50 = vsel %vm1325_vm11, %v2603_v51, %v2383_v0  ;;  %v2509_v0 = vsel %vm1193_vm7, %v2479_v62, %v4513_v57 }
 0x266   : > { %2286 = vrot.lane.b32.xlu1 %v4558_v63, %s3469_s9  ;;  %2396 = vrot.lane.b32.xlu0 %v4558_v63, %s3470_s12  ;;  %v1936_v39 = vrot.slane %v1934_v58, 7  ;;  %v2541_v5 = vsel %vm1226_vm8, %v2509_v0, %v2273_v40 }
 0x267   : > { %v1869_v49 = vrot.slane %v1867_v18, 7 }
 0x268   : > { %v4592_v35 = vpop.permute.xlu1 %2354  ;;  %v1939_v31 = vor.u32 %v1937_v21, %v1936_v39  ;;  %v1943_v57 = vsel %vm3524_vm2, %v1936_v39, 0 }
 0x269   : > { %v1872_v25 = vor.u32 %v1870_v42, %v1869_v49  ;;  %v4594_v23 = vpop.permute.xlu0 %2448  ;;  %v1932_v28 = vsel %vm3524_vm2, %v1869_v49, 0 }
 0x26a   : > { %2330 = vrot.lane.b32.xlu1 %v2111_v27, %s3472_s16  ;;  %2428 = vrot.lane.b32.xlu0 %v2111_v27, %s3473_s17  ;;  %v2227_v36 = vrot.slane %v1932_v28, 1  ;;  %v2120_v26 = vshll.u32 %v1932_v28, 16  ;;  %v1942_v47 = vsel %vm3524_vm2, 0, %v1939_v31 }
 0x26b   : > { %v4604_v14 = vsel %vm3524_vm2, 0, %v1872_v25  ;;  %v2295_v49 = vshll.u32 %v1942_v47, 16  ;;  %v2293_v28 = vshrl.u32 %v1942_v47, 16 }
 0x26c   : > { %v4606_v60 = vpop.permute.xlu1 %2241  ;;  %v2115_v33 = vshll.u32 %v4604_v14, 16  ;;  %v2226_v13 = vrot.slane %v4604_v14, 1  ;;  %v2113_v4 = vshrl.u32 %v4604_v14, 16  ;;  %v2122_v19 = vrot.slane %v2120_v26, 1 }
 0x26d   : > { %v4611_v8 = vpop.permute.xlu0 %2243  ;;  %v2297_v61 = vrot.slane %v2295_v49, 1 }
 0x26e   : > { %2366 = vrot.lane.b32.xlu1 %v2225_v37, %s3471_s15  ;;  %2460 = vrot.lane.b32.xlu0 %v2225_v37, %s3474_s18  ;;  %v2117_v38 = vrot.slane %v2115_v33, 1  ;;  %v2228_v45 = vsel %vm853_vm3, %v2226_v13, %v2227_v36  ;;  %v2300_v33 = vshll.u32 %v1943_v57, 16  ;;  %v2337_v36 = vrot.slane %v1942_v47, 1 }
 0x26f   : > { %v2298_v13 = vor.u32 %v2297_v61, %v2293_v28 }
 0x270   : > { %v4620_v29 = vpop.permute.xlu1 %2318  ;;  %v2118_v43 = vor.u32 %v2117_v38, %v2113_v4  ;;  %v2302_v2 = vrot.slane %v2300_v33, 1  ;;  %v2338_v4 = vrot.slane %v1943_v57, 1 }
 0x271   : > { %v2447_v44 = vpop.permute.xlu0 %2446 }
 0x272   : > { %2398 = vrot.lane.b32.xlu1 %v4604_v14, %s3470_s12  ;;  %2462 = vrot.lane.b32.xlu0 %v2228_v45, %s3474_s18  ;;  %v2123_v46 = vsel %vm596_vm4, %v2118_v43, %v2122_v19  ;;  %v2303_v38 = vsel %vm596_vm4, %v2298_v13, %v2302_v2 }
 0x274   : > { %v4630_v55 = vpop.permute.xlu1 %2138 }
 0x275   : > { %v2353_v53 = vpop.permute.xlu0 %2352 }
 0x276   : > { %2430 = vrot.lane.b32.xlu1 %v2123_v46, %s3473_s17  ;;  %2255 = vrot.lane.b32.xlu0 %v2225_v37, %s3467_s30 }
 0x278   : > { %v2415_v7 = vpop.permute.xlu1 %2414 }
 0x279   : > { %v2667_v9 = vsel %vm1358_vm12, %v2635_v50, %v2415_v7  ;;  %v2417_v15 = vpop.permute.xlu0 %2416 }
 0x27a   : > { %2150 = vrot.lane.b32.xlu1 %v2111_v27, %s3468_s8  ;;  %2288 = vrot.lane.b32.xlu0 %v4604_v14, %s3469_s9  ;;  %v2699_v18 = vsel %vm1391_vm13, %v2667_v9, %v2447_v44  ;;  %v2339_v44 = vsel %vm853_vm3, %v2337_v36, %v2338_v4 }
 0x27b   : > { %3360 = vmatmul.mubr.msk.bf16.gmra.mrb[8].mxu1 %vm1444_vm14, %v2699_v18 }
 0x27c   : > { %v2137_v22 = vpop.permute.xlu1 %2136 }
 0x27d   : > { %v2317_v41 = vpop.permute.xlu0 %2316 }
 0x27e   : > { %v2573_v42 = vsel %vm1259_vm9, %v2541_v5, %v2317_v41  ;;  %2152 = vrot.lane.b32.xlu1 %v2123_v46, %s3468_s8  ;;  %2332 = vrot.lane.b32.xlu0 %v2123_v46, %s3472_s16 }
 0x27f   : > { %v2605_v24 = vsel %vm1292_vm10, %v2573_v42, %v2353_v53 }
 0x280   : > { %v2637_v25 = vsel %vm1325_vm11, %v2605_v24, %v4579_v54  ;;  %v2279_v27 = vpop.permute.xlu1 %2278 }
 0x281   : > { %v2389_v20 = vpop.permute.xlu0 %2388  ;;  %v2669_v40 = vsel %vm1358_vm12, %v2637_v25, %v2417_v15 }
 0x282   : > { %2257 = vrot.lane.b32.xlu1 %v2228_v45, %s3467_s30  ;;  %2368 = vrot.lane.b32.xlu0 %v2228_v45, %s3471_s15  ;;  %v2701_v16 = vsel %vm1391_vm13, %v2669_v40, %v4594_v23  ;;  %v2481_v23 = vsel %vm1160_vm6, %v4286_v59, %v2137_v22 }
 0x283   : > { %3363 = vmatprep.mubr.msk.bf16.mxu1 %vm1444_vm14, %v2701_v16  ;;  %v2511_v45 = vsel %vm1193_vm7, %v2481_v23, %v4606_v60 }
 0x284   : > { %v2387_v54 = vpop.permute.xlu1 %2386  ;;  %v2543_v39 = vsel %vm1226_vm8, %v2511_v45, %v4575_v30  ;;  %v2483_v30 = vsel %vm1160_vm6, %v4276_v56, %v4630_v55 }
 0x285   : > { %v2277_v37 = vpop.permute.xlu0 %2276  ;;  %v2575_v59 = vsel %vm1259_vm9, %v2543_v39, %v4620_v29 }
 0x286   : > { %2290 = vrot.lane.b32.xlu1 %v1942_v47, %s3469_s9  ;;  %2400 = vrot.lane.b32.xlu0 %v1942_v47, %s3470_s12  ;;  %v2607_v60 = vsel %vm1292_vm10, %v2575_v59, %v4592_v35 }
 0x287   : > { %v2639_v53 = vsel %vm1325_vm11, %v2607_v60, %v2387_v54 }
 0x288   : > { %v2359_v58 = vpop.permute.xlu1 %2358 }
 0x289   : > { %v2453_v1 = vpop.permute.xlu0 %2452 }
 0x28a   : > { %2334 = vrot.lane.b32.xlu1 %v2303_v38, %s3472_s16  ;;  %2432 = vrot.lane.b32.xlu0 %v2303_v38, %s3473_s17 }
 0x28c   : > { %v2246_v26 = vpop.permute.xlu1 %2245 }
 0x28d   : > { %v2248_v48 = vpop.permute.xlu0 %2247 }
 0x28e   : > { %2370 = vrot.lane.b32.xlu1 %v2339_v44, %s3471_s15  ;;  %2464 = vrot.lane.b32.xlu0 %v2339_v44, %s3474_s18  ;;  %s3268_s15 = sshll.u32 %s4950_s25, 8 }
 0x290   : > { %v2323_v43 = vpop.permute.xlu1 %2322 }
 0x291   : > { %v2451_v19 = vpop.permute.xlu0 %2450 }
 0x292   : > { %2402 = vrot.lane.b32.xlu1 %v3530_v3, %s3470_s12 }
 0x294   : > { %v2143_v21 = vpop.permute.xlu1 %2142 }
 0x295   : > { %v2357_v34 = vpop.permute.xlu0 %2356 }
 0x296   : > { %2434 = vrot.lane.b32.xlu1 %v3554_v17, %s3473_s17  ;;  %v2513_v17 = vsel %vm1193_vm7, %v2483_v30, %v4611_v8 }
 0x297   : > { %v2545_v51 = vsel %vm1226_vm8, %v2513_v17, %v2277_v37 }
 0x298   : > { %v2419_v46 = vpop.permute.xlu1 %2418 }
 0x299   : > { %v2671_v3 = vsel %vm1358_vm12, %v2639_v53, %v2419_v46  ;;  %v2421_v31 = vpop.permute.xlu0 %2420 }
 0x29a   : > { %2466 = vrot.lane.b32.xlu1 %v3541_v10, %s3474_s18  ;;  %v2703_v29 = vsel %vm1391_vm13, %v2671_v3, %v2451_v19  ;;  %s4799_s18 = scalar_lea.vmem %s4946_s7, %s3268_s15 }
 0x29b   : > { %3364 = vmatmul.mubr.msk.bf16.gmra.mrb[12].mxu1 %vm1444_vm14, %v2703_v29 }
 0x29c   : > { %v2141_v35 = vpop.permute.xlu1 %2140 }
 0x29d   : > { %v2485_v50 = vsel %vm1160_vm6, %v4348_v6, %v2141_v35  ;;  %v2321_v56 = vpop.permute.xlu0 %2320 }
 0x29e   : > { %v2577_v55 = vsel %vm1259_vm9, %v2545_v51, %v2321_v56  ;;  %v2515_v10 = vsel %vm1193_vm7, %v2485_v50, %v2246_v26 }
 0x29f   : > { %v2609_v7 = vsel %vm1292_vm10, %v2577_v55, %v2357_v34  ;;  %v2547_v18 = vsel %vm1226_vm8, %v2515_v10, %v2279_v27 }
 0x2a0   : > { %v2641_v62 = vsel %vm1325_vm11, %v2609_v7, %v2389_v20  ;;  %v2391_v9 = vpop.permute.xlu1 %2390  ;;  %v2579_v0 = vsel %vm1259_vm9, %v2547_v18, %v2323_v43  ;;  %v2487_v20 = vsel %vm1160_vm6, %v4336_v11, %v2143_v21 }
 0x2a1   : > { %v2673_v15 = vsel %vm1358_vm12, %v2641_v62, %v2421_v31  ;;  %v2611_v41 = vsel %vm1292_vm10, %v2579_v0, %v2359_v58  ;;  %v2517_v16 = vsel %vm1193_vm7, %v2487_v20, %v2248_v48 }
 0x2a2   : > { %v2705_v8 = vsel %vm1391_vm13, %v2673_v15, %v2453_v1  ;;  %v2643_v42 = vsel %vm1325_vm11, %v2611_v41, %v2391_v9 }
 0x2a3   : > { %3367 = vmatprep.mubr.msk.bf16.mxu1 %vm1444_vm14, %v2705_v8  ;;  %v2455_v47 = vpop.permute.xlu0 %2454 }
 0x2a4   : > { %v2283_v6 = vpop.permute.xlu1 %2282 }
 0x2a7   : > { %v2281_v22 = vpop.permute.xlu0 %2280 }
 0x2a8   : > { %v2250_v5 = vpop.permute.xlu1 %2249  ;;  %v2549_v28 = vsel %vm1226_vm8, %v2517_v16, %v2281_v22 }
 0x2ab   : > { %v2325_v49 = vpop.permute.xlu0 %2324 }
 0x2ac   : > { %v2423_v24 = vpop.permute.xlu1 %2422  ;;  %v2581_v54 = vsel %vm1259_vm9, %v2549_v28, %v2325_v49 }
 0x2ad   : > { %v2675_v25 = vsel %vm1358_vm12, %v2643_v42, %v2423_v24 }
 0x2ae   : > { %v2707_v57 = vsel %vm1391_vm13, %v2675_v25, %v2455_v47 }
 0x2af   : > { %3368 = vmatmul.mubr.msk.bf16.gmra.mrb[16].mxu1 %vm1444_vm14, %v2707_v57  ;;  %v2361_v27 = vpop.permute.xlu0 %2360 }
 0x2b0   : > { %v2145_v61 = vpop.permute.xlu1 %2144  ;;  %v2613_v37 = vsel %vm1292_vm10, %v2581_v54, %v2361_v27 }
 0x2b1   : > { %v2489_v11 = vsel %vm1160_vm6, %v4420_v52, %v2145_v61 }
 0x2b2   : > { %v2519_v36 = vsel %vm1193_vm7, %v2489_v11, %v2250_v5 }
 0x2b3   : > { %v2393_v40 = vpop.permute.xlu0 %2392  ;;  %v2551_v4 = vsel %vm1226_vm8, %v2519_v36, %v2283_v6 }
 0x2b4   : > { %v2645_v13 = vsel %vm1325_vm11, %v2613_v37, %v2393_v40  ;;  %v2327_v2 = vpop.permute.xlu1 %2326 }
 0x2b5   : > { %v2583_v44 = vsel %vm1259_vm9, %v2551_v4, %v2327_v2 }
 0x2b7   : > { %v2425_v33 = vpop.permute.xlu0 %2424 }
 0x2b8   : > { %v2677_v58 = vsel %vm1358_vm12, %v2645_v13, %v2425_v33  ;;  %v2363_v23 = vpop.permute.xlu1 %2362 }
 0x2b9   : > { %v2615_v45 = vsel %vm1292_vm10, %v2583_v44, %v2363_v23 }
 0x2bb   : > { %v2457_v1 = vpop.permute.xlu0 %2456 }
 0x2bc   : > { %v2709_v38 = vsel %vm1391_vm13, %v2677_v58, %v2457_v1 }
 0x2bd   : > { %3371 = vmatprep.mubr.msk.bf16.mxu1 %vm1444_vm14, %v2709_v38 }
 0x2c1   : > { %v2395_v26 = vpop.permute.xlu1 %2394 }
 0x2c2   : > { %v2647_v43 = vsel %vm1325_vm11, %v2615_v45, %v2395_v26 }
 0x2c4   : > { %v2459_v48 = vpop.permute.xlu0 %2458 }
 0x2c8   : > { %v2427_v39 = vpop.permute.xlu1 %2426  ;;  %v2252_v19 = vpop.permute.xlu0 %2251 }
 0x2c9   : > { %v2679_v59 = vsel %vm1358_vm12, %v2647_v43, %v2427_v39 }
 0x2ca   : > { %v2711_v52 = vsel %vm1391_vm13, %v2679_v59, %v2459_v48 }
 0x2cb   : > { %3372 = vmatmul.mubr.msk.bf16.gmra.mrb[20].mxu1 %vm1444_vm14, %v2711_v52 }
 0x2cc   : > { %v2147_v21 = vpop.permute.xlu1 %2146  ;;  %v2285_v34 = vpop.permute.xlu0 %2284 }
 0x2cd   : > { %v2491_v46 = vsel %vm1160_vm6, %v4436_v12, %v2147_v21 }
 0x2ce   : > { %v2521_v31 = vsel %vm1193_vm7, %v2491_v46, %v2252_v19 }
 0x2cf   : > { %v2553_v35 = vsel %vm1226_vm8, %v2521_v31, %v2285_v34  ;;  %v4783_v34 = vld [vmem:[%s4945_s6] ss:$0 sm:$0xff] }
 0x2d0   : > { %v2149_v60 = vpop.permute.xlu1 %2148  ;;  %v2329_v53 = vpop.permute.xlu0 %2328  ;;  %v3443_v31 = vld [vmem:[%s3546_s29] sm:$0xff]  }
 0x2d1   : > { %v2585_v56 = vsel %vm1259_vm9, %v2553_v35, %v2329_v53  ;;  %v2493_v15 = vsel %vm1160_vm6, %v4521_v32, %v2149_v60  ;;  %v3442_v53 = vld [vmem:[%s3546_s29 + $0x8] sm:$0xff]  }
 0x2d2   : > { %v3016_v46 = vunpack.c.l.bf16 %v3442_v53 }
 0x2d4   : > { %v2254_v30 = vpop.permute.xlu1 %2253  ;;  %v2365_v3 = vpop.permute.xlu0 %2364 }
 0x2d5   : > { %v2617_v55 = vsel %vm1292_vm10, %v2585_v56, %v2365_v3  ;;  %v2523_v8 = vsel %vm1193_vm7, %v2493_v15, %v2254_v30 }
 0x2d8   : > { %v2287_v29 = vpop.permute.xlu1 %2286  ;;  %v2397_v17 = vpop.permute.xlu0 %2396 }
 0x2d9   : > { %v2649_v7 = vsel %vm1325_vm11, %v2617_v55, %v2397_v17  ;;  %v2555_v6 = vsel %vm1226_vm8, %v2523_v8, %v2287_v29  ;;  %v3014_v29 = vunpack.c.l.bf16 %v3443_v31 }
 0x2dc   : > { %v2331_v51 = vpop.permute.xlu1 %2330  ;;  %v2429_v50 = vpop.permute.xlu0 %2428 }
 0x2dd   : > { %v2681_v10 = vsel %vm1358_vm12, %v2649_v7, %v2429_v50  ;;  %v2587_v0 = vsel %vm1259_vm9, %v2555_v6, %v2331_v51  ;;  %v3017_v50 = vunpack.c.h.bf16 %v3442_v53 }
 0x2e0   : > { %v2367_v62 = vpop.permute.xlu1 %2366  ;;  %v2461_v12 = vpop.permute.xlu0 %2460 }
 0x2e1   : > { %v2713_v9 = vsel %vm1391_vm13, %v2681_v10, %v2461_v12  ;;  %v2619_v22 = vsel %vm1292_vm10, %v2587_v0, %v2367_v62  ;;  %v3015_v10 = vunpack.c.h.bf16 %v3443_v31 }
 0x2e2   : > { %3375 = vmatprep.mubr.msk.bf16.mxu1 %vm1444_vm14, %v2713_v9 }
 0x2e4   : > { %v2399_v18 = vpop.permute.xlu1 %2398  ;;  %v2463_v47 = vpop.permute.xlu0 %2462 }
 0x2e5   : > { %v2651_v5 = vsel %vm1325_vm11, %v2619_v22, %v2399_v18 }
 0x2e8   : > { %v2431_v41 = vpop.permute.xlu1 %2430  ;;  %v2256_v49 = vpop.permute.xlu0 %2255 }
 0x2e9   : > { %v2683_v42 = vsel %vm1358_vm12, %v2651_v5, %v2431_v41 }
 0x2ea   : > { %v2715_v24 = vsel %vm1391_vm13, %v2683_v42, %v2463_v47 }
 0x2eb   : > { %3376 = vmatmul.mubr.msk.bf16.gmra.mrb[24].mxu1 %vm1444_vm14, %v2715_v24 }
 0x2ec   : > { %v2151_v32 = vpop.permute.xlu1 %2150  ;;  %v2289_v25 = vpop.permute.xlu0 %2288 }
 0x2ed   : > { %v2495_v20 = vsel %vm1160_vm6, %v4558_v63, %v2151_v32 }
 0x2ee   : > { %v2525_v16 = vsel %vm1193_vm7, %v2495_v20, %v2256_v49  ;;  %v3444_v49 = vld [vmem:[%s3546_s29 + $0x18] sm:$0xff]  }
 0x2ef   : > { %v2557_v54 = vsel %vm1226_vm8, %v2525_v16, %v2289_v25  ;;  %v3020_v42 = vunpack.c.l.bf16 %v3444_v49  ;;  %v3445_v25 = vld [vmem:[%s3546_s29 + $0x10] sm:$0xff]  }
 0x2f0   : > { %v2153_v57 = vpop.permute.xlu1 %2152  ;;  %v2333_v27 = vpop.permute.xlu0 %2332 }
 0x2f1   : > { %v2589_v2 = vsel %vm1259_vm9, %v2557_v54, %v2333_v27  ;;  %v2497_v4 = vsel %vm1160_vm6, %v4604_v14, %v2153_v57  ;;  %v4777_v14 = vld [vmem:[%s4944_s5] ss:$0 sm:$0xff]  ;;  %v3018_v57 = vunpack.c.l.bf16 %v3445_v25  ;;  %v3019_v54 = vunpack.c.h.bf16 %v3445_v25 }
 0x2f4   : > { %v2258_v40 = vpop.permute.xlu1 %2257  ;;  %v2369_v61 = vpop.permute.xlu0 %2368 }
 0x2f5   : > { %v2621_v58 = vsel %vm1292_vm10, %v2589_v2, %v2369_v61  ;;  %v2527_v26 = vsel %vm1193_vm7, %v2497_v4, %v2258_v40  ;;  %v3021_v61 = vunpack.c.h.bf16 %v3444_v49 }
 0x2f8   : > { %v2291_v28 = vpop.permute.xlu1 %2290  ;;  %v2401_v33 = vpop.permute.xlu0 %2400 }
 0x2f9   : > { %v2653_v1 = vsel %vm1325_vm11, %v2621_v58, %v2401_v33  ;;  %v2559_v48 = vsel %vm1226_vm8, %v2527_v26, %v2291_v28 }
 0x2fc   : > { %v2335_v37 = vpop.permute.xlu1 %2334  ;;  %v2433_v13 = vpop.permute.xlu0 %2432 }
 0x2fd   : > { %v2685_v38 = vsel %vm1358_vm12, %v2653_v1, %v2433_v13  ;;  %v2591_v45 = vsel %vm1259_vm9, %v2559_v48, %v2335_v37  ;;  %v3446_v48 = vld [vmem:[%s3546_s29 + $0x28] sm:$0xff]  }
 0x300   : > { %v2371_v11 = vpop.permute.xlu1 %2370  ;;  %v2465_v63 = vpop.permute.xlu0 %2464 }
 0x301   : > { %v2717_v36 = vsel %vm1391_vm13, %v2685_v38, %v2465_v63  ;;  %v2623_v43 = vsel %vm1292_vm10, %v2591_v45, %v2371_v11 }
 0x302   : > { %3379 = vmatprep.mubr.msk.bf16.mxu1 %vm1444_vm14, %v2717_v36 }
 0x304   : > { %v2403_v23 = vpop.permute.xlu1 %2402 }
 0x305   : > { %v2655_v39 = vsel %vm1325_vm11, %v2623_v43, %v2403_v23 }
 0x308   : > { %v2435_v44 = vpop.permute.xlu1 %2434 }
 0x309   : > { %v2687_v19 = vsel %vm1358_vm12, %v2655_v39, %v2435_v44  ;;  %v3024_v44 = vunpack.c.l.bf16 %v3446_v48  ;;  %v3447_v39 = vld [vmem:[%s3546_s29 + $0x20] sm:$0xff]  }
 0x30c   : > { %v2467_v59 = vpop.permute.xlu1 %2466 }
 0x30d   : > { %v2719_v52 = vsel %vm1391_vm13, %v2687_v19, %v2467_v59  ;;  %v3022_v19 = vunpack.c.l.bf16 %v3447_v39 }
 0x30e   : > { %v3353_v21 = vpop.f32.mrb[0].mxu1  ;;  %3380 = vmatmul.mubr.msk.bf16.gmra.mrb[28].mxu1 %vm1444_vm14, %v2719_v52 }
 0x30f   : > { %v2945_v60 = vmul.f32 %v3353_v21, %v4777_v14  ;;  %v2809_v30 = vpop.f32.mrb[1].mxu1 }
 0x310   : > { %v2943_v3 = vmul.f32 %v4777_v14, %v2809_v30  ;;  %v3354_v17 = vpop.f32.mrb[2].mxu1 }
 0x311   : > { %v2984_v35 = vadd.f32 %v4783_v34, %v2945_v60  ;;  %v2946_v51 = vmul.f32 %v3354_v17, %v4777_v14  ;;  %v2812_v56 = vpop.f32.mrb[3].mxu1  ;;  %v3025_v60 = vunpack.c.h.bf16 %v3446_v48 }
 0x312   : > { %v2982_v55 = vadd.f32 %v4783_v34, %v2943_v3  ;;  %v2944_v7 = vmul.f32 %v4777_v14, %v2812_v56  ;;  %v3023_v3 = vunpack.c.h.bf16 %v3447_v39 }
 0x313   : > { %v3048_v62 = vadd.f32 %v3016_v46, %v2984_v35  ;;  %v2985_v12 = vadd.f32 %v4783_v34, %v2946_v51 }
 0x314   : > { %v3046_v9 = vadd.f32 %v3014_v29, %v2982_v55  ;;  %v2983_v15 = vadd.f32 %v4783_v34, %v2944_v7 }
 0x315   : > { %v3080_v8 = vmax.f32 %v3048_v62, 0.0  ;;  %v3049_v18 = vadd.f32 %v3017_v50, %v2985_v12 }
 0x316   : > { %v3078_v47 = vmax.f32 %v3046_v9, 0.0  ;;  %v3047_v6 = vadd.f32 %v3015_v10, %v2983_v15  ;;  %v3448_v9 = vld [vmem:[%s3546_s29 + $0x38] sm:$0xff]  }
 0x317   : > { %3112 = vst.msk [vmem:[%s4799_s18 + $0x10] sm:$0xff] %vm1160_vm6, %v3080_v8  ;;  %v3081_v0 = vmax.f32 %v3049_v18, 0.0  ;;  %v3028_v15 = vunpack.c.l.bf16 %v3448_v9 }
 0x318   : > { %3110 = vst.msk [vmem:[%s4799_s18] sm:$0xff] %vm1160_vm6, %v3078_v47  ;;  %v3079_v22 = vmax.f32 %v3047_v6, 0.0  ;;  %v3449_v47 = vld [vmem:[%s3546_s29 + $0x30] sm:$0xff]  }
 0x319   : > { %3113 = vst.msk [vmem:[%s4799_s18 + $0x18] sm:$0xff] %vm1160_vm6, %v3081_v0  ;;  %v3026_v6 = vunpack.c.l.bf16 %v3449_v47 }
 0x31a   : > { %3111 = vst.msk [vmem:[%s4799_s18 + $0x8] sm:$0xff] %vm1160_vm6, %v3079_v22 }
 0x32e   : > { %v3357_v5 = vpop.f32.mrb[4].mxu1 }
 0x32f   : > { %v2949_v41 = vmul.f32 %v3357_v5, %v4777_v14  ;;  %v2825_v24 = vpop.f32.mrb[5].mxu1 }
 0x330   : > { %v2947_v32 = vmul.f32 %v4777_v14, %v2825_v24  ;;  %v3358_v27 = vpop.f32.mrb[6].mxu1 }
 0x331   : > { %v2988_v20 = vadd.f32 %v4783_v34, %v2949_v41  ;;  %v2950_v40 = vmul.f32 %v3358_v27, %v4777_v14  ;;  %v2828_v16 = vpop.f32.mrb[7].mxu1  ;;  %v3029_v41 = vunpack.c.h.bf16 %v3448_v9 }
 0x332   : > { %v2986_v28 = vadd.f32 %v4783_v34, %v2947_v32  ;;  %v2948_v33 = vmul.f32 %v4777_v14, %v2828_v16  ;;  %v3027_v32 = vunpack.c.h.bf16 %v3449_v47 }
 0x333   : > { %v3052_v37 = vadd.f32 %v3020_v42, %v2988_v20  ;;  %v2989_v13 = vadd.f32 %v4783_v34, %v2950_v40 }
 0x334   : > { %v3050_v2 = vadd.f32 %v3018_v57, %v2986_v28  ;;  %v2987_v58 = vadd.f32 %v4783_v34, %v2948_v33 }
 0x335   : > { %v3084_v1 = vmax.f32 %v3052_v37, 0.0  ;;  %v3053_v38 = vadd.f32 %v3021_v61, %v2989_v13 }
 0x336   : > { %v3082_v11 = vmax.f32 %v3050_v2, 0.0  ;;  %v3051_v63 = vadd.f32 %v3019_v54, %v2987_v58  ;;  %v3450_v2 = vld [vmem:[%s3546_s29 + $0x48] sm:$0xff]  }
 0x337   : > { %3116 = vst.msk [vmem:[%s4799_s18 + $0x30] sm:$0xff] %vm1160_vm6, %v3084_v1  ;;  %v3085_v36 = vmax.f32 %v3053_v38, 0.0  ;;  %v3032_v58 = vunpack.c.l.bf16 %v3450_v2 }
 0x338   : > { %3114 = vst.msk [vmem:[%s4799_s18 + $0x20] sm:$0xff] %vm1160_vm6, %v3082_v11  ;;  %v3083_v23 = vmax.f32 %v3051_v63, 0.0  ;;  %v3451_v11 = vld [vmem:[%s3546_s29 + $0x40] sm:$0xff]  }
 0x339   : > { %3117 = vst.msk [vmem:[%s4799_s18 + $0x38] sm:$0xff] %vm1160_vm6, %v3085_v36  ;;  %v3030_v63 = vunpack.c.l.bf16 %v3451_v11 }
 0x33a   : > { %3115 = vst.msk [vmem:[%s4799_s18 + $0x28] sm:$0xff] %vm1160_vm6, %v3083_v23 }
 0x34e   : > { %v3361_v4 = vpop.f32.mrb[8].mxu1 }
 0x34f   : > { %v2953_v26 = vmul.f32 %v3361_v4, %v4777_v14  ;;  %v2841_v45 = vpop.f32.mrb[9].mxu1 }
 0x350   : > { %v2951_v43 = vmul.f32 %v4777_v14, %v2841_v45  ;;  %v3362_v59 = vpop.f32.mrb[10].mxu1 }
 0x351   : > { %v2992_v52 = vadd.f32 %v4783_v34, %v2953_v26  ;;  %v2954_v21 = vmul.f32 %v3362_v59, %v4777_v14  ;;  %v2844_v53 = vpop.f32.mrb[11].mxu1  ;;  %v3033_v26 = vunpack.c.h.bf16 %v3450_v2 }
 0x352   : > { %v2990_v46 = vadd.f32 %v4783_v34, %v2951_v43  ;;  %v2952_v30 = vmul.f32 %v4777_v14, %v2844_v53  ;;  %v3031_v43 = vunpack.c.h.bf16 %v3451_v11 }
 0x353   : > { %v3056_v31 = vadd.f32 %v3024_v44, %v2992_v52  ;;  %v2993_v29 = vadd.f32 %v4783_v34, %v2954_v21 }
 0x354   : > { %v3054_v17 = vadd.f32 %v3022_v19, %v2990_v46  ;;  %v2991_v35 = vadd.f32 %v4783_v34, %v2952_v30 }
 0x355   : > { %v3088_v51 = vmax.f32 %v3056_v31, 0.0  ;;  %v3057_v50 = vadd.f32 %v3025_v60, %v2993_v29 }
 0x356   : > { %v3086_v56 = vmax.f32 %v3054_v17, 0.0  ;;  %v3055_v55 = vadd.f32 %v3023_v3, %v2991_v35  ;;  %v3452_v17 = vld [vmem:[%s3546_s29 + $0x58] sm:$0xff]  }
 0x357   : > { %3120 = vst.msk [vmem:[%s4799_s18 + $0x50] sm:$0xff] %vm1160_vm6, %v3088_v51  ;;  %v3089_v7 = vmax.f32 %v3057_v50, 0.0  ;;  %v3036_v35 = vunpack.c.l.bf16 %v3452_v17 }
 0x358   : > { %3118 = vst.msk [vmem:[%s4799_s18 + $0x40] sm:$0xff] %vm1160_vm6, %v3086_v56  ;;  %v3087_v10 = vmax.f32 %v3055_v55, 0.0  ;;  %v3453_v56 = vld [vmem:[%s3546_s29 + $0x50] sm:$0xff]  }
 0x359   : > { %3121 = vst.msk [vmem:[%s4799_s18 + $0x58] sm:$0xff] %vm1160_vm6, %v3089_v7  ;;  %v3034_v55 = vunpack.c.l.bf16 %v3453_v56 }
 0x35a   : > { %3119 = vst.msk [vmem:[%s4799_s18 + $0x48] sm:$0xff] %vm1160_vm6, %v3087_v10 }
 0x36e   : > { %v3365_v62 = vpop.f32.mrb[12].mxu1 }
 0x36f   : > { %v2957_v12 = vmul.f32 %v3365_v62, %v4777_v14  ;;  %v2857_v8 = vpop.f32.mrb[13].mxu1 }
 0x370   : > { %v2955_v18 = vmul.f32 %v4777_v14, %v2857_v8  ;;  %v3366_v0 = vpop.f32.mrb[14].mxu1 }
 0x371   : > { %v2996_v22 = vadd.f32 %v4783_v34, %v2957_v12  ;;  %v2958_v5 = vmul.f32 %v3366_v0, %v4777_v14  ;;  %v2860_v49 = vpop.f32.mrb[15].mxu1  ;;  %v3037_v12 = vunpack.c.h.bf16 %v3452_v17 }
 0x372   : > { %v2994_v42 = vadd.f32 %v4783_v34, %v2955_v18  ;;  %v2956_v24 = vmul.f32 %v4777_v14, %v2860_v49  ;;  %v3035_v18 = vunpack.c.h.bf16 %v3453_v56 }
 0x373   : > { %v3060_v25 = vadd.f32 %v3028_v15, %v2996_v22  ;;  %v2997_v57 = vadd.f32 %v4783_v34, %v2958_v5 }
 0x374   : > { %v3058_v27 = vadd.f32 %v3026_v6, %v2994_v42  ;;  %v2995_v20 = vadd.f32 %v4783_v34, %v2956_v24 }
 0x375   : > { %v3092_v40 = vmax.f32 %v3060_v25, 0.0  ;;  %v3061_v61 = vadd.f32 %v3029_v41, %v2997_v57 }
 0x376   : > { %v3090_v16 = vmax.f32 %v3058_v27, 0.0  ;;  %v3059_v28 = vadd.f32 %v3027_v32, %v2995_v20  ;;  %v3454_v27 = vld [vmem:[%s3546_s29 + $0x68] sm:$0xff]  }
 0x377   : > { %3124 = vst.msk [vmem:[%s4799_s18 + $0x70] sm:$0xff] %vm1160_vm6, %v3092_v40  ;;  %v3093_v33 = vmax.f32 %v3061_v61, 0.0  ;;  %v3040_v20 = vunpack.c.l.bf16 %v3454_v27 }
 0x378   : > { %3122 = vst.msk [vmem:[%s4799_s18 + $0x60] sm:$0xff] %vm1160_vm6, %v3090_v16  ;;  %v3091_v54 = vmax.f32 %v3059_v28, 0.0  ;;  %v3455_v16 = vld [vmem:[%s3546_s29 + $0x60] sm:$0xff]  }
 0x379   : > { %3125 = vst.msk [vmem:[%s4799_s18 + $0x78] sm:$0xff] %vm1160_vm6, %v3093_v33  ;;  %v3038_v28 = vunpack.c.l.bf16 %v3455_v16 }
 0x37a   : > { %3123 = vst.msk [vmem:[%s4799_s18 + $0x68] sm:$0xff] %vm1160_vm6, %v3091_v54 }
 0x382   : > { %v3369_v37 = vpop.f32.mrb[16].mxu1 }
 0x383   : > { %v2961_v13 = vmul.f32 %v3369_v37, %v4777_v14  ;;  %v2873_v1 = vpop.f32.mrb[17].mxu1 }
 0x384   : > { %v2959_v38 = vmul.f32 %v4777_v14, %v2873_v1  ;;  %v3370_v36 = vpop.f32.mrb[18].mxu1 }
 0x385   : > { %v3000_v23 = vadd.f32 %v4783_v34, %v2961_v13  ;;  %v2962_v4 = vmul.f32 %v3370_v36, %v4777_v14  ;;  %v2876_v48 = vpop.f32.mrb[19].mxu1  ;;  %v3041_v13 = vunpack.c.h.bf16 %v3454_v27 }
 0x386   : > { %v2998_v44 = vadd.f32 %v4783_v34, %v2959_v38  ;;  %v2960_v45 = vmul.f32 %v4777_v14, %v2876_v48  ;;  %v3039_v38 = vunpack.c.h.bf16 %v3455_v16 }
 0x387   : > { %v3064_v39 = vadd.f32 %v3032_v58, %v3000_v23  ;;  %v3001_v19 = vadd.f32 %v4783_v34, %v2962_v4 }
 0x388   : > { %v3062_v59 = vadd.f32 %v3030_v63, %v2998_v44  ;;  %v2999_v52 = vadd.f32 %v4783_v34, %v2960_v45 }
 0x389   : > { %v3096_v21 = vmax.f32 %v3064_v39, 0.0  ;;  %v3065_v60 = vadd.f32 %v3033_v26, %v3001_v19 }
 0x38a   : > { %v3094_v53 = vmax.f32 %v3062_v59, 0.0  ;;  %v3063_v46 = vadd.f32 %v3031_v43, %v2999_v52  ;;  %v3456_v59 = vld [vmem:[%s3546_s29 + $0x78] sm:$0xff]  }
 0x38b   : > { %3128 = vst.msk [vmem:[%s4799_s18 + $0x90] sm:$0xff] %vm1160_vm6, %v3096_v21  ;;  %v3097_v30 = vmax.f32 %v3065_v60, 0.0  ;;  %v3044_v52 = vunpack.c.l.bf16 %v3456_v59 }
 0x38c   : > { %3126 = vst.msk [vmem:[%s4799_s18 + $0x80] sm:$0xff] %vm1160_vm6, %v3094_v53  ;;  %v3095_v3 = vmax.f32 %v3063_v46, 0.0  ;;  %v3457_v53 = vld [vmem:[%s3546_s29 + $0x70] sm:$0xff]  }
 0x38d   : > { %3129 = vst.msk [vmem:[%s4799_s18 + $0x98] sm:$0xff] %vm1160_vm6, %v3097_v30  ;;  %v3042_v46 = vunpack.c.l.bf16 %v3457_v53 }
 0x38e   : > { %3127 = vst.msk [vmem:[%s4799_s18 + $0x88] sm:$0xff] %vm1160_vm6, %v3095_v3 }
 0x39e   : > { %v3373_v31 = vpop.f32.mrb[20].mxu1 }
 0x39f   : > { %v2965_v29 = vmul.f32 %v3373_v31, %v4777_v14  ;;  %v2889_v51 = vpop.f32.mrb[21].mxu1 }
 0x3a0   : > { %v2963_v50 = vmul.f32 %v4777_v14, %v2889_v51  ;;  %v3374_v7 = vpop.f32.mrb[22].mxu1 }
 0x3a1   : > { %v3004_v10 = vadd.f32 %v4783_v34, %v2965_v29  ;;  %v2966_v62 = vmul.f32 %v3374_v7, %v4777_v14  ;;  %v2892_v9 = vpop.f32.mrb[23].mxu1  ;;  %v3045_v29 = vunpack.c.h.bf16 %v3456_v59 }
 0x3a2   : > { %v3002_v15 = vadd.f32 %v4783_v34, %v2963_v50  ;;  %v2964_v8 = vmul.f32 %v4777_v14, %v2892_v9  ;;  %v3043_v50 = vunpack.c.h.bf16 %v3457_v53 }
 0x3a3   : > { %v3068_v47 = vadd.f32 %v3036_v35, %v3004_v10  ;;  %v3005_v6 = vadd.f32 %v4783_v34, %v2966_v62 }
 0x3a4   : > { %v3066_v0 = vadd.f32 %v3034_v55, %v3002_v15  ;;  %v3003_v22 = vadd.f32 %v4783_v34, %v2964_v8 }
 0x3a5   : > { %v3100_v5 = vmax.f32 %v3068_v47, 0.0  ;;  %v3069_v41 = vadd.f32 %v3037_v12, %v3005_v6 }
 0x3a6   : > { %v3098_v49 = vmax.f32 %v3066_v0, 0.0  ;;  %v3067_v42 = vadd.f32 %v3035_v18, %v3003_v22 }
 0x3a7   : > { %3132 = vst.msk [vmem:[%s4799_s18 + $0xb0] sm:$0xff] %vm1160_vm6, %v3100_v5  ;;  %v3101_v24 = vmax.f32 %v3069_v41, 0.0 }
 0x3a8   : > { %3130 = vst.msk [vmem:[%s4799_s18 + $0xa0] sm:$0xff] %vm1160_vm6, %v3098_v49  ;;  %v3099_v32 = vmax.f32 %v3067_v42, 0.0 }
 0x3a9   : > { %3133 = vst.msk [vmem:[%s4799_s18 + $0xb8] sm:$0xff] %vm1160_vm6, %v3101_v24 }
 0x3aa   : > { %3131 = vst.msk [vmem:[%s4799_s18 + $0xa8] sm:$0xff] %vm1160_vm6, %v3099_v32 }
 0x3be   : > { %v3377_v25 = vpop.f32.mrb[24].mxu1 }
 0x3bf   : > { %v2969_v57 = vmul.f32 %v3377_v25, %v4777_v14  ;;  %v2905_v40 = vpop.f32.mrb[25].mxu1 }
 0x3c0   : > { %v2967_v61 = vmul.f32 %v4777_v14, %v2905_v40  ;;  %v3378_v33 = vpop.f32.mrb[26].mxu1 }
 0x3c1   : > { %v3008_v54 = vadd.f32 %v4783_v34, %v2969_v57  ;;  %v2970_v37 = vmul.f32 %v3378_v33, %v4777_v14  ;;  %v2908_v2 = vpop.f32.mrb[27].mxu1 }
 0x3c2   : > { %v3006_v58 = vadd.f32 %v4783_v34, %v2967_v61  ;;  %v2968_v1 = vmul.f32 %v4777_v14, %v2908_v2 }
 0x3c3   : > { %v3072_v11 = vadd.f32 %v3040_v20, %v3008_v54  ;;  %v3009_v63 = vadd.f32 %v4783_v34, %v2970_v37 }
 0x3c4   : > { %v3070_v36 = vadd.f32 %v3038_v28, %v3006_v58  ;;  %v3007_v23 = vadd.f32 %v4783_v34, %v2968_v1 }
 0x3c5   : > { %v3104_v4 = vmax.f32 %v3072_v11, 0.0  ;;  %v3073_v26 = vadd.f32 %v3041_v13, %v3009_v63 }
 0x3c6   : > { %v3102_v48 = vmax.f32 %v3070_v36, 0.0  ;;  %v3071_v44 = vadd.f32 %v3039_v38, %v3007_v23 }
 0x3c7   : > { %3136 = vst.msk [vmem:[%s4799_s18 + $0xd0] sm:$0xff] %vm1160_vm6, %v3104_v4  ;;  %v3105_v45 = vmax.f32 %v3073_v26, 0.0 }
 0x3c8   : > { %3134 = vst.msk [vmem:[%s4799_s18 + $0xc0] sm:$0xff] %vm1160_vm6, %v3102_v48  ;;  %v3103_v43 = vmax.f32 %v3071_v44, 0.0 }
 0x3c9   : > { %3137 = vst.msk [vmem:[%s4799_s18 + $0xd8] sm:$0xff] %vm1160_vm6, %v3105_v45 }
 0x3ca   : > { %3135 = vst.msk [vmem:[%s4799_s18 + $0xc8] sm:$0xff] %vm1160_vm6, %v3103_v43 }
 0x3e1   : > { %v3381_v39 = vpop.f32.mrb[28].mxu1 }
 0x3e2   : > { %v2973_v19 = vmul.f32 %v3381_v39, %v4777_v14  ;;  %v2921_v21 = vpop.f32.mrb[29].mxu1 }
 0x3e3   : > { %v2971_v60 = vmul.f32 %v4777_v14, %v2921_v21  ;;  %v3382_v30 = vpop.f32.mrb[30].mxu1 }
 0x3e4   : > { %v3012_v3 = vadd.f32 %v4783_v34, %v2973_v19  ;;  %v2974_v31 = vmul.f32 %v3382_v30, %v4777_v14  ;;  %v2924_v17 = vpop.f32.mrb[31].mxu1 }
 0x3e5   : > { %v3010_v35 = vadd.f32 %v4783_v34, %v2971_v60  ;;  %v2972_v51 = vmul.f32 %v4777_v14, %v2924_v17 }
 0x3e6   : > { %v3076_v56 = vadd.f32 %v3044_v52, %v3012_v3  ;;  %v3013_v55 = vadd.f32 %v4783_v34, %v2974_v31 }
 0x3e7   : > { %v3074_v7 = vadd.f32 %v3042_v46, %v3010_v35  ;;  %v3011_v10 = vadd.f32 %v4783_v34, %v2972_v51 }
 0x3e8   : > { %v3108_v62 = vmax.f32 %v3076_v56, 0.0  ;;  %v3077_v12 = vadd.f32 %v3045_v29, %v3013_v55 }
 0x3e9   : > { %v3106_v9 = vmax.f32 %v3074_v7, 0.0  ;;  %v3075_v15 = vadd.f32 %v3043_v50, %v3011_v10 }
 0x3ea   : > { %3140 = vst.msk [vmem:[%s4799_s18 + $0xf0] sm:$0xff] %vm1160_vm6, %v3108_v62  ;;  %v3109_v8 = vmax.f32 %v3077_v12, 0.0 }
 0x3eb   : > { %3138 = vst.msk [vmem:[%s4799_s18 + $0xe0] sm:$0xff] %vm1160_vm6, %v3106_v9  ;;  %v3107_v18 = vmax.f32 %v3075_v15, 0.0 }
 0x3ec   : > { %3141 = vst.msk [vmem:[%s4799_s18 + $0xf8] sm:$0xff] %vm1160_vm6, %v3109_v8 }
 0x3ed   : > { %3139 = vst.msk [vmem:[%s4799_s18 + $0xe8] sm:$0xff] %vm1160_vm6, %v3107_v18 }
 0x3ee PF: > { %s17_s24 = sadd.s32 1, %s3464_s24  }
 0x3ef   : > { %p14_p4 = scmp.ge.s32.totalorder %s17_s24, 4  }
 0x3f1   :  { %16 = sbr.rel (!%p14_p4) target bundleno = 1 (0x1), region = 78 }

</bundles_post_ra>
